<compile_context>
chip_gen: v7x
topology: tpu7x:2x2x1
jax: 0.10.0
libtpu: 0.0.40
codegen_flags: <defaults>
</compile_context>

<pallas_src>
import functools

import numpy as np

import jax
import jax.numpy as jnp
from jax.experimental import pallas as pl
from jax.experimental.pallas import tpu as pltpu

LRELU_VALUE = 0.1


def _round_up(x, m):
    return (x + m - 1) // m * m


# ----------------------------------------------------------------------------
# Fused Pallas kernel: the entire HFAB forward for one group of images.
# ----------------------------------------------------------------------------
def _hfab_fused_kernel(x_ref, mask_ref, sqw_ref, sqb_ref, bw_ref, bb_ref,
                       exw_ref, exb_ref, o_ref, im2col_ref, *,
                       W, n_blocks, cn_pad, cm_pad, c_out, dot_dtype):
    x = x_ref[...].astype(jnp.float32)                    # (cn_pad, L)
    L = x.shape[1]

    # Precomputed boundary masks (resident input); load each row once per
    # invocation and reuse across all convs.
    mask_rows = [mask_ref[pl.ds(k, 1), :] for k in range(9)]   # each (1, L) f32

    def conv3x3(act, cin_pad, w_mat, b_col):
        # act: (cin_pad, L) f32; w_mat: (cout_pad, 9*cin_pad) dot_dtype;
        # b_col: (cout_pad, 1) f32.
        for k in range(9):
            oy, ox = k // 3 - 1, k % 3 - 1
            off = oy * W + ox
            if off == 0:
                tap = act                                  # center tap: no shift
            else:
                # XLU lane rotation; mask zeros every out-of-image (and hence
                # every cross-image / wrap-around) neighbor -> SAME padding.
                tap = pltpu.roll(act, (-off) % L, 1) * mask_rows[k]
            # Static sublane-offset write into the persistent im2col scratch.
            im2col_ref[pl.ds(k * cin_pad, cin_pad), :] = tap
        rhs = im2col_ref[pl.ds(0, 9 * cin_pad), :].astype(dot_dtype)
        out = jax.lax.dot_general(
            w_mat, rhs,
            dimension_numbers=(((1,), (0,)), ((), ())),
            preferred_element_type=jnp.float32)            # (cout_pad, L), MXU
        return out + b_col                                 # lane-broadcast bias

    def lrelu(t):
        return jnp.where(t >= 0, t, LRELU_VALUE * t)

    # squeeze + act
    out = lrelu(conv3x3(x, cn_pad, sqw_ref[...], sqb_ref[...]))

    # BasicBlocks: conv1 -> lrelu -> conv2; HFAB's act() after the Sequential
    # is fused after the last block's conv2.
    for i in range(n_blocks):
        out = lrelu(conv3x3(out, cm_pad, bw_ref[2 * i], bb_ref[2 * i]))
        out = conv3x3(out, cm_pad, bw_ref[2 * i + 1], bb_ref[2 * i + 1])
        if i == n_blocks - 1:
            out = lrelu(out)
    if n_blocks == 0:            # empty Sequential: act() still applies
        out = lrelu(out)

    # excitate -> sigmoid -> multiply by the original input; only the real
    # C channels are written out (no padded-row writeback).
    attn = jax.nn.sigmoid(conv3x3(out, cm_pad, exw_ref[...], exb_ref[...]))
    o_ref[...] = (attn[:c_out, :] * x[:c_out, :]).astype(o_ref.dtype)


# ----------------------------------------------------------------------------
# Host-side helpers
# ----------------------------------------------------------------------------
def _make_tap_masks(H, W, n_images):
    """(9, n_images*H*W) f32: 1 where the 3x3 neighbor lies inside the image."""
    hh, ww = np.meshgrid(np.arange(H), np.arange(W), indexing="ij")
    hh = hh.reshape(-1)
    ww = ww.reshape(-1)
    masks = np.empty((9, n_images * H * W), np.float32)
    for k in range(9):
        oy, ox = k // 3 - 1, k % 3 - 1
        valid = ((hh + oy >= 0) & (hh + oy < H) &
                 (ww + ox >= 0) & (ww + ox < W)).astype(np.float32)
        masks[k] = np.tile(valid, n_images)
    return jnp.asarray(masks)


def _prep_w(w_oihw, cin_pad, cout_pad, dot_dtype):
    """PyTorch OIHW -> (Cout_pad, 9*Cin_pad) matmul layout (zero-padded)."""
    cout, cin, _, _ = w_oihw.shape
    w = jnp.transpose(w_oihw, (0, 2, 3, 1)).reshape(cout, 9, cin)  # (Cout,9,Cin)
    w = jnp.pad(w, ((0, cout_pad - cout), (0, 0), (0, cin_pad - cin)))
    return w.reshape(cout_pad, 9 * cin_pad).astype(dot_dtype)


def _prep_b(b, cout_pad):
    return jnp.pad(b, (0, cout_pad - b.shape[0])).reshape(cout_pad, 1)


def _auto_groups(B, HW):
    """1 grid step on single-TC chips; 2 parallel steps on 2-TC chips."""
    try:
        dev = jax.devices()[0]
        ncores = getattr(dev, "num_cores", None) or getattr(dev, "core_count", None) or 1
    except Exception:  # pragma: no cover - defensive
        ncores = 1
    if ncores >= 2 and B % 2 == 0 and ((B // 2) * HW) % 128 == 0:
        return 2
    return 1


# ----------------------------------------------------------------------------
# HFAB forward (wrapper around the single fused pallas_call)
# ----------------------------------------------------------------------------
def hfab_forward(x_nchw, params, *, dot_dtype=jnp.bfloat16, groups=None):
    """x_nchw: (B, n_feats, H, W) like PyTorch. Returns same layout."""
    B, C, H, W = x_nchw.shape
    HW = H * W
    up_blocks = len(params["blocks"])
    mid = params["squeeze"][0].shape[0]

    if groups is None:
        groups = _auto_groups(B, HW)
    if B % groups != 0 or ((B // groups) * HW) % 128 != 0:
        groups = 1
    bg = B // groups
    L = bg * HW                      # lane extent per grid step

    cn_pad = _round_up(C, 8)
    cm_pad = _round_up(mid, 8)

    sq_w = _prep_w(params["squeeze"][0], cn_pad, cm_pad, dot_dtype)
    sq_b = _prep_b(params["squeeze"][1], cm_pad)
    ex_w = _prep_w(params["excitate"][0], cm_pad, cn_pad, dot_dtype)
    ex_b = _prep_b(params["excitate"][1], cn_pad)
    if up_blocks > 0:
        blk_w = jnp.stack([_prep_w(w, cm_pad, cm_pad, dot_dtype)
                           for (w1, b1, w2, b2) in params["blocks"]
                           for w in (w1, w2)])            # (2*ub, cm_pad, 9*cm_pad)
        blk_b = jnp.stack([_prep_b(b, cm_pad)
                           for (w1, b1, w2, b2) in params["blocks"]
                           for b in (b1, b2)])            # (2*ub, cm_pad, 1)
    else:
        blk_w = jnp.zeros((1, cm_pad, 9 * cm_pad), dot_dtype)
        blk_b = jnp.zeros((1, cm_pad, 1), jnp.float32)

    # Boundary masks (per-group; identical across groups), built on the host.
    masks = _make_tap_masks(H, W, bg)                     # (9, L) f32

    # Lane-dense, batch-folded activation layout: (C_pad, B*H*W).
    x_cb = jnp.transpose(x_nchw.reshape(B, C, HW), (1, 0, 2)).reshape(C, B * HW)
    x_cb = jnp.pad(x_cb, ((0, cn_pad - C), (0, 0)))

    kern = functools.partial(_hfab_fused_kernel, W=W, n_blocks=up_blocks,
                             cn_pad=cn_pad, cm_pad=cm_pad, c_out=C,
                             dot_dtype=dot_dtype)
    out = pl.pallas_call(
        kern,
        out_shape=jax.ShapeDtypeStruct((C, B * HW), x_nchw.dtype),
        grid=(groups,),
        in_specs=[
            pl.BlockSpec((cn_pad, L), lambda g: (0, g)),
            pl.BlockSpec(masks.shape, lambda g: (0, 0)),
            pl.BlockSpec(sq_w.shape, lambda g: (0, 0)),
            pl.BlockSpec(sq_b.shape, lambda g: (0, 0)),
            pl.BlockSpec(blk_w.shape, lambda g: (0, 0, 0)),
            pl.BlockSpec(blk_b.shape, lambda g: (0, 0, 0)),
            pl.BlockSpec(ex_w.shape, lambda g: (0, 0)),
            pl.BlockSpec(ex_b.shape, lambda g: (0, 0)),
        ],
        out_specs=pl.BlockSpec((C, L), lambda g: (0, g)),
        scratch_shapes=[pltpu.VMEM((9 * max(cn_pad, cm_pad), L), jnp.float32)],
        compiler_params=pltpu.CompilerParams(
            dimension_semantics=("parallel",),
            vmem_limit_bytes=32 * 1024 * 1024,   # safe on v5e/v6e/v7x
        ),
    )(x_cb, masks, sq_w, sq_b, blk_w, blk_b, ex_w, ex_b)

    return jnp.transpose(out.reshape(C, B, HW), (1, 0, 2)).reshape(B, C, H, W)


# ----------------------------------------------------------------------------
# Parameter init (PyTorch-style OIHW weights, 1-D biases)
# ----------------------------------------------------------------------------
def _init_conv(key, cin, cout):
    kw, kb = jax.random.split(key)
    std = (1.0 / (9.0 * cin)) ** 0.5
    w = jax.random.normal(kw, (cout, cin, 3, 3), jnp.float32) * std
    b = jax.random.normal(kb, (cout,), jnp.float32) * 0.01
    return w, b


def init_hfab_params(key, n_feats, up_blocks, mid_feats):
    keys = jax.random.split(key, 2 + 2 * up_blocks)
    params = {}
    params["squeeze"] = _init_conv(keys[0], n_feats, mid_feats)
    params["excitate"] = _init_conv(keys[1], mid_feats, n_feats)
    params["blocks"] = []
    for i in range(up_blocks):
        w1, b1 = _init_conv(keys[2 + 2 * i], mid_feats, mid_feats)
        w2, b2 = _init_conv(keys[3 + 2 * i], mid_feats, mid_feats)
        params["blocks"].append((w1, b1, w2, b2))
    return params


# ----------------------------------------------------------------------------
# Pure-JAX reference for verification
# ----------------------------------------------------------------------------
def _conv_ref(x, w, b):  # x: NCHW, w: OIHW, b: (Cout,)
    y = jax.lax.conv_general_dilated(
        x, w, (1, 1), "SAME", dimension_numbers=("NCHW", "OIHW", "NCHW"))
    return y + b[None, :, None, None]


def _lrelu_ref(x):
    return jnp.where(x >= 0, x, LRELU_VALUE * x)


def hfab_ref(x, params):
    sw, sb = params["squeeze"]
    out = _lrelu_ref(_conv_ref(x, sw, sb))
    for (w1, b1, w2, b2) in params["blocks"]:
        out = _conv_ref(_lrelu_ref(_conv_ref(out, w1, b1)), w2, b2)
    out = _lrelu_ref(out)
    ew, eb = params["excitate"]
    return jax.nn.sigmoid(_conv_ref(out, ew, eb)) * x


# ----------------------------------------------------------------------------
if __name__ == "__main__":
    B, n_feats, H, W = 2, 4, 16, 16
    up_blocks, mid_feats = 2, 3

    key = jax.random.PRNGKey(0)
    kx, kp = jax.random.split(key)
    x = jax.random.normal(kx, (B, n_feats, H, W), jnp.float32)
    params = init_hfab_params(kp, n_feats, up_blocks, mid_feats)

    ref = jax.block_until_ready(hfab_ref(x, params))

    # Exact-math mode (f32 dot operands): tight correctness check.
    out_f32 = jax.block_until_ready(
        jax.jit(functools.partial(hfab_forward, dot_dtype=jnp.float32))(x, params))
    assert out_f32.shape == (B, n_feats, H, W)
    err_f32 = float(jnp.max(jnp.abs(out_f32 - ref)))
    assert err_f32 < 1e-4, f"f32 mismatch vs reference: {err_f32}"

    # Perf mode (default, bf16 dot operands with f32 MXU accumulation).
    out_bf16 = jax.block_until_ready(jax.jit(hfab_forward)(x, params))
    assert out_bf16.shape == (B, n_feats, H, W)
    err_bf16 = float(jnp.max(jnp.abs(out_bf16 - ref)))
    assert err_bf16 < 5e-2, f"bf16 mismatch vs reference: {err_bf16}"

    print("KERNEL_OK")
</pallas_src>

<mosaic_0001>
module attributes {stable_mosaic.version = 11 : i64} {
  func.func @_hfab_fused_kernel(%arg0: i32, %arg1: memref<8x512xf32, #tpu.memory_space<vmem>>, %arg2: memref<9x512xf32, #tpu.memory_space<vmem>>, %arg3: memref<8x72xf32, #tpu.memory_space<vmem>>, %arg4: memref<8x1xf32, #tpu.memory_space<vmem>>, %arg5: memref<4x8x72xf32, #tpu.memory_space<vmem>>, %arg6: memref<4x8x1xf32, #tpu.memory_space<vmem>>, %arg7: memref<8x72xf32, #tpu.memory_space<vmem>>, %arg8: memref<8x1xf32, #tpu.memory_space<vmem>>, %arg9: memref<4x512xf32, #tpu.memory_space<vmem>>, %arg10: memref<72x512xf32, #tpu.memory_space<vmem>>) attributes {dimension_semantics = [#tpu.dimension_semantics<parallel>], iteration_bounds = array<i64: 1>, scalar_prefetch = 0 : i64, scratch_operands = 1 : i64, tpu.core_type = #tpu.core_type<tc>, window_params = [{transform_indices = @transform_0, window_bounds = array<i64: 8, 512>}, {pipeline_mode = #tpu.pipeline_mode<synchronous>, transform_indices = @transform_1, window_bounds = array<i64: 9, 512>}, {pipeline_mode = #tpu.pipeline_mode<synchronous>, transform_indices = @transform_2, window_bounds = array<i64: 8, 72>}, {pipeline_mode = #tpu.pipeline_mode<synchronous>, transform_indices = @transform_3, window_bounds = array<i64: 8, 1>}, {pipeline_mode = #tpu.pipeline_mode<synchronous>, transform_indices = @transform_4, window_bounds = array<i64: 4, 8, 72>}, {pipeline_mode = #tpu.pipeline_mode<synchronous>, transform_indices = @transform_5, window_bounds = array<i64: 4, 8, 1>}, {pipeline_mode = #tpu.pipeline_mode<synchronous>, transform_indices = @transform_6, window_bounds = array<i64: 8, 72>}, {pipeline_mode = #tpu.pipeline_mode<synchronous>, transform_indices = @transform_7, window_bounds = array<i64: 8, 1>}, {transform_indices = @transform_8, window_bounds = array<i64: 4, 512>}]} {
    %c0 = arith.constant 0 : index
    %c0_0 = arith.constant 0 : index
    %0 = vector.load %arg1[%c0, %c0_0] : memref<8x512xf32, #tpu.memory_space<vmem>>, vector<8x512xf32>
    %c0_1 = arith.constant 0 : index
    %c0_2 = arith.constant 0 : index
    %1 = vector.load %arg2[%c0_1, %c0_2] : memref<9x512xf32, #tpu.memory_space<vmem>>, vector<1x512xf32>
    %c1 = arith.constant 1 : index
    %c0_3 = arith.constant 0 : index
    %2 = vector.load %arg2[%c1, %c0_3] : memref<9x512xf32, #tpu.memory_space<vmem>>, vector<1x512xf32>
    %c2 = arith.constant 2 : index
    %c0_4 = arith.constant 0 : index
    %3 = vector.load %arg2[%c2, %c0_4] : memref<9x512xf32, #tpu.memory_space<vmem>>, vector<1x512xf32>
    %c3 = arith.constant 3 : index
    %c0_5 = arith.constant 0 : index
    %4 = vector.load %arg2[%c3, %c0_5] : memref<9x512xf32, #tpu.memory_space<vmem>>, vector<1x512xf32>
    %c5 = arith.constant 5 : index
    %c0_6 = arith.constant 0 : index
    %5 = vector.load %arg2[%c5, %c0_6] : memref<9x512xf32, #tpu.memory_space<vmem>>, vector<1x512xf32>
    %c6 = arith.constant 6 : index
    %c0_7 = arith.constant 0 : index
    %6 = vector.load %arg2[%c6, %c0_7] : memref<9x512xf32, #tpu.memory_space<vmem>>, vector<1x512xf32>
    %c7 = arith.constant 7 : index
    %c0_8 = arith.constant 0 : index
    %7 = vector.load %arg2[%c7, %c0_8] : memref<9x512xf32, #tpu.memory_space<vmem>>, vector<1x512xf32>
    %c8 = arith.constant 8 : index
    %c0_9 = arith.constant 0 : index
    %8 = vector.load %arg2[%c8, %c0_9] : memref<9x512xf32, #tpu.memory_space<vmem>>, vector<1x512xf32>
    %c0_10 = arith.constant 0 : index
    %c0_11 = arith.constant 0 : index
    %9 = vector.load %arg3[%c0_10, %c0_11] : memref<8x72xf32, #tpu.memory_space<vmem>>, vector<8x72xf32>
    %c0_12 = arith.constant 0 : index
    %c0_13 = arith.constant 0 : index
    %10 = vector.load %arg4[%c0_12, %c0_13] : memref<8x1xf32, #tpu.memory_space<vmem>>, vector<8x1xf32>
    %c17_i32 = arith.constant 17 : i32
    %11 = tpu.dynamic_rotate %0 by %c17_i32 dim 1 : vector<8x512xf32>, i32 -> vector<8x512xf32>
    %12 = vector.broadcast %1 : vector<1x512xf32> to vector<8x512xf32>
    %13 = arith.mulf %11, %12 : vector<8x512xf32>
    %c0_14 = arith.constant 0 : index
    %c0_15 = arith.constant 0 : index
    %14 = vector.load %arg10[%c0_14, %c0_15] : memref<72x512xf32, #tpu.memory_space<vmem>>, vector<8x512xf32>
    tpu.vector_store %arg10[%c0_14, %c0_15], %13 {strides = array<i32>} : memref<72x512xf32, #tpu.memory_space<vmem>>, vector<8x512xf32>,
    %c16_i32 = arith.constant 16 : i32
    %15 = tpu.dynamic_rotate %0 by %c16_i32 dim 1 : vector<8x512xf32>, i32 -> vector<8x512xf32>
    %16 = vector.broadcast %2 : vector<1x512xf32> to vector<8x512xf32>
    %17 = arith.mulf %15, %16 : vector<8x512xf32>
    %c8_16 = arith.constant 8 : index
    %c0_17 = arith.constant 0 : index
    %18 = vector.load %arg10[%c8_16, %c0_17] : memref<72x512xf32, #tpu.memory_space<vmem>>, vector<8x512xf32>
    tpu.vector_store %arg10[%c8_16, %c0_17], %17 {strides = array<i32>} : memref<72x512xf32, #tpu.memory_space<vmem>>, vector<8x512xf32>,
    %c15_i32 = arith.constant 15 : i32
    %19 = tpu.dynamic_rotate %0 by %c15_i32 dim 1 : vector<8x512xf32>, i32 -> vector<8x512xf32>
    %20 = vector.broadcast %3 : vector<1x512xf32> to vector<8x512xf32>
    %21 = arith.mulf %19, %20 : vector<8x512xf32>
    %c16 = arith.constant 16 : index
    %c0_18 = arith.constant 0 : index
    %22 = vector.load %arg10[%c16, %c0_18] : memref<72x512xf32, #tpu.memory_space<vmem>>, vector<8x512xf32>
    tpu.vector_store %arg10[%c16, %c0_18], %21 {strides = array<i32>} : memref<72x512xf32, #tpu.memory_space<vmem>>, vector<8x512xf32>,
    %c1_i32 = arith.constant 1 : i32
    %23 = tpu.dynamic_rotate %0 by %c1_i32 dim 1 : vector<8x512xf32>, i32 -> vector<8x512xf32>
    %24 = vector.broadcast %4 : vector<1x512xf32> to vector<8x512xf32>
    %25 = arith.mulf %23, %24 : vector<8x512xf32>
    %c24 = arith.constant 24 : index
    %c0_19 = arith.constant 0 : index
    %26 = vector.load %arg10[%c24, %c0_19] : memref<72x512xf32, #tpu.memory_space<vmem>>, vector<8x512xf32>
    tpu.vector_store %arg10[%c24, %c0_19], %25 {strides = array<i32>} : memref<72x512xf32, #tpu.memory_space<vmem>>, vector<8x512xf32>,
    %c32 = arith.constant 32 : index
    %c0_20 = arith.constant 0 : index
    %27 = vector.load %arg10[%c32, %c0_20] : memref<72x512xf32, #tpu.memory_space<vmem>>, vector<8x512xf32>
    tpu.vector_store %arg10[%c32, %c0_20], %0 {strides = array<i32>} : memref<72x512xf32, #tpu.memory_space<vmem>>, vector<8x512xf32>,
    %c511_i32 = arith.constant 511 : i32
    %28 = tpu.dynamic_rotate %0 by %c511_i32 dim 1 : vector<8x512xf32>, i32 -> vector<8x512xf32>
    %29 = vector.broadcast %5 : vector<1x512xf32> to vector<8x512xf32>
    %30 = arith.mulf %28, %29 : vector<8x512xf32>
    %c40 = arith.constant 40 : index
    %c0_21 = arith.constant 0 : index
    %31 = vector.load %arg10[%c40, %c0_21] : memref<72x512xf32, #tpu.memory_space<vmem>>, vector<8x512xf32>
    tpu.vector_store %arg10[%c40, %c0_21], %30 {strides = array<i32>} : memref<72x512xf32, #tpu.memory_space<vmem>>, vector<8x512xf32>,
    %c497_i32 = arith.constant 497 : i32
    %32 = tpu.dynamic_rotate %0 by %c497_i32 dim 1 : vector<8x512xf32>, i32 -> vector<8x512xf32>
    %33 = vector.broadcast %6 : vector<1x512xf32> to vector<8x512xf32>
    %34 = arith.mulf %32, %33 : vector<8x512xf32>
    %c48 = arith.constant 48 : index
    %c0_22 = arith.constant 0 : index
    %35 = vector.load %arg10[%c48, %c0_22] : memref<72x512xf32, #tpu.memory_space<vmem>>, vector<8x512xf32>
    tpu.vector_store %arg10[%c48, %c0_22], %34 {strides = array<i32>} : memref<72x512xf32, #tpu.memory_space<vmem>>, vector<8x512xf32>,
    %c496_i32 = arith.constant 496 : i32
    %36 = tpu.dynamic_rotate %0 by %c496_i32 dim 1 : vector<8x512xf32>, i32 -> vector<8x512xf32>
    %37 = vector.broadcast %7 : vector<1x512xf32> to vector<8x512xf32>
    %38 = arith.mulf %36, %37 : vector<8x512xf32>
    %c56 = arith.constant 56 : index
    %c0_23 = arith.constant 0 : index
    %39 = vector.load %arg10[%c56, %c0_23] : memref<72x512xf32, #tpu.memory_space<vmem>>, vector<8x512xf32>
    tpu.vector_store %arg10[%c56, %c0_23], %38 {strides = array<i32>} : memref<72x512xf32, #tpu.memory_space<vmem>>, vector<8x512xf32>,
    %c495_i32 = arith.constant 495 : i32
    %40 = tpu.dynamic_rotate %0 by %c495_i32 dim 1 : vector<8x512xf32>, i32 -> vector<8x512xf32>
    %41 = vector.broadcast %8 : vector<1x512xf32> to vector<8x512xf32>
    %42 = arith.mulf %40, %41 : vector<8x512xf32>
    %c64 = arith.constant 64 : index
    %c0_24 = arith.constant 0 : index
    %43 = vector.load %arg10[%c64, %c0_24] : memref<72x512xf32, #tpu.memory_space<vmem>>, vector<8x512xf32>
    tpu.vector_store %arg10[%c64, %c0_24], %42 {strides = array<i32>} : memref<72x512xf32, #tpu.memory_space<vmem>>, vector<8x512xf32>,
    %c0_25 = arith.constant 0 : index
    %c0_26 = arith.constant 0 : index
    %44 = vector.load %arg10[%c0_25, %c0_26] : memref<72x512xf32, #tpu.memory_space<vmem>>, vector<72x512xf32>
    %cst = arith.constant dense<0.000000e+00> : vector<8x512xf32>
    %45 = tpu.matmul %9, %44, %cst {dimension_numbers = #tpu.dot_dimension_numbers<[1], [0], [0], [1], [0, 0, 1, 1], [], []>} : vector<8x72xf32>, vector<72x512xf32>, vector<8x512xf32> -> vector<8x512xf32>
    %46 = vector.broadcast %10 : vector<8x1xf32> to vector<8x512xf32>
    %47 = arith.addf %45, %46 : vector<8x512xf32>
    %cst_27 = arith.constant 0.000000e+00 : f32
    %48 = vector.broadcast %cst_27 : f32 to vector<8x512xf32>
    %49 = arith.cmpf oge, %47, %48 : vector<8x512xf32>
    %cst_28 = arith.constant 1.000000e-01 : f32
    %50 = vector.broadcast %cst_28 : f32 to vector<8x512xf32>
    %51 = arith.mulf %50, %47 : vector<8x512xf32>
    %52 = arith.select %49, %47, %51 : vector<8x512xi1>, vector<8x512xf32>
    %c0_29 = arith.constant 0 : index
    %c0_30 = arith.constant 0 : index
    %c0_31 = arith.constant 0 : index
    %53 = vector.load %arg5[%c0_29, %c0_30, %c0_31] : memref<4x8x72xf32, #tpu.memory_space<vmem>>, vector<1x8x72xf32>
    %54 = vector.shape_cast %53 : vector<1x8x72xf32> to vector<8x72xf32>
    %c0_32 = arith.constant 0 : index
    %c0_33 = arith.constant 0 : index
    %c0_34 = arith.constant 0 : index
    %55 = vector.load %arg6[%c0_32, %c0_33, %c0_34] : memref<4x8x1xf32, #tpu.memory_space<vmem>>, vector<1x8x1xf32>
    %56 = vector.shape_cast %55 : vector<1x8x1xf32> to vector<8x1xf32>
    %c17_i32_35 = arith.constant 17 : i32
    %57 = tpu.dynamic_rotate %52 by %c17_i32_35 dim 1 : vector<8x512xf32>, i32 -> vector<8x512xf32>
    %58 = vector.broadcast %1 : vector<1x512xf32> to vector<8x512xf32>
    %59 = arith.mulf %57, %58 : vector<8x512xf32>
    %c0_36 = arith.constant 0 : index
    %c0_37 = arith.constant 0 : index
    %60 = vector.load %arg10[%c0_36, %c0_37] : memref<72x512xf32, #tpu.memory_space<vmem>>, vector<8x512xf32>
    tpu.vector_store %arg10[%c0_36, %c0_37], %59 {strides = array<i32>} : memref<72x512xf32, #tpu.memory_space<vmem>>, vector<8x512xf32>,
    %c16_i32_38 = arith.constant 16 : i32
    %61 = tpu.dynamic_rotate %52 by %c16_i32_38 dim 1 : vector<8x512xf32>, i32 -> vector<8x512xf32>
    %62 = vector.broadcast %2 : vector<1x512xf32> to vector<8x512xf32>
    %63 = arith.mulf %61, %62 : vector<8x512xf32>
    %c8_39 = arith.constant 8 : index
    %c0_40 = arith.constant 0 : index
    %64 = vector.load %arg10[%c8_39, %c0_40] : memref<72x512xf32, #tpu.memory_space<vmem>>, vector<8x512xf32>
    tpu.vector_store %arg10[%c8_39, %c0_40], %63 {strides = array<i32>} : memref<72x512xf32, #tpu.memory_space<vmem>>, vector<8x512xf32>,
    %c15_i32_41 = arith.constant 15 : i32
    %65 = tpu.dynamic_rotate %52 by %c15_i32_41 dim 1 : vector<8x512xf32>, i32 -> vector<8x512xf32>
    %66 = vector.broadcast %3 : vector<1x512xf32> to vector<8x512xf32>
    %67 = arith.mulf %65, %66 : vector<8x512xf32>
    %c16_42 = arith.constant 16 : index
    %c0_43 = arith.constant 0 : index
    %68 = vector.load %arg10[%c16_42, %c0_43] : memref<72x512xf32, #tpu.memory_space<vmem>>, vector<8x512xf32>
    tpu.vector_store %arg10[%c16_42, %c0_43], %67 {strides = array<i32>} : memref<72x512xf32, #tpu.memory_space<vmem>>, vector<8x512xf32>,
    %c1_i32_44 = arith.constant 1 : i32
    %69 = tpu.dynamic_rotate %52 by %c1_i32_44 dim 1 : vector<8x512xf32>, i32 -> vector<8x512xf32>
    %70 = vector.broadcast %4 : vector<1x512xf32> to vector<8x512xf32>
    %71 = arith.mulf %69, %70 : vector<8x512xf32>
    %c24_45 = arith.constant 24 : index
    %c0_46 = arith.constant 0 : index
    %72 = vector.load %arg10[%c24_45, %c0_46] : memref<72x512xf32, #tpu.memory_space<vmem>>, vector<8x512xf32>
    tpu.vector_store %arg10[%c24_45, %c0_46], %71 {strides = array<i32>} : memref<72x512xf32, #tpu.memory_space<vmem>>, vector<8x512xf32>,
    %c32_47 = arith.constant 32 : index
    %c0_48 = arith.constant 0 : index
    %73 = vector.load %arg10[%c32_47, %c0_48] : memref<72x512xf32, #tpu.memory_space<vmem>>, vector<8x512xf32>
    tpu.vector_store %arg10[%c32_47, %c0_48], %52 {strides = array<i32>} : memref<72x512xf32, #tpu.memory_space<vmem>>, vector<8x512xf32>,
    %c511_i32_49 = arith.constant 511 : i32
    %74 = tpu.dynamic_rotate %52 by %c511_i32_49 dim 1 : vector<8x512xf32>, i32 -> vector<8x512xf32>
    %75 = vector.broadcast %5 : vector<1x512xf32> to vector<8x512xf32>
    %76 = arith.mulf %74, %75 : vector<8x512xf32>
    %c40_50 = arith.constant 40 : index
    %c0_51 = arith.constant 0 : index
    %77 = vector.load %arg10[%c40_50, %c0_51] : memref<72x512xf32, #tpu.memory_space<vmem>>, vector<8x512xf32>
    tpu.vector_store %arg10[%c40_50, %c0_51], %76 {strides = array<i32>} : memref<72x512xf32, #tpu.memory_space<vmem>>, vector<8x512xf32>,
    %c497_i32_52 = arith.constant 497 : i32
    %78 = tpu.dynamic_rotate %52 by %c497_i32_52 dim 1 : vector<8x512xf32>, i32 -> vector<8x512xf32>
    %79 = vector.broadcast %6 : vector<1x512xf32> to vector<8x512xf32>
    %80 = arith.mulf %78, %79 : vector<8x512xf32>
    %c48_53 = arith.constant 48 : index
    %c0_54 = arith.constant 0 : index
    %81 = vector.load %arg10[%c48_53, %c0_54] : memref<72x512xf32, #tpu.memory_space<vmem>>, vector<8x512xf32>
    tpu.vector_store %arg10[%c48_53, %c0_54], %80 {strides = array<i32>} : memref<72x512xf32, #tpu.memory_space<vmem>>, vector<8x512xf32>,
    %c496_i32_55 = arith.constant 496 : i32
    %82 = tpu.dynamic_rotate %52 by %c496_i32_55 dim 1 : vector<8x512xf32>, i32 -> vector<8x512xf32>
    %83 = vector.broadcast %7 : vector<1x512xf32> to vector<8x512xf32>
    %84 = arith.mulf %82, %83 : vector<8x512xf32>
    %c56_56 = arith.constant 56 : index
    %c0_57 = arith.constant 0 : index
    %85 = vector.load %arg10[%c56_56, %c0_57] : memref<72x512xf32, #tpu.memory_space<vmem>>, vector<8x512xf32>
    tpu.vector_store %arg10[%c56_56, %c0_57], %84 {strides = array<i32>} : memref<72x512xf32, #tpu.memory_space<vmem>>, vector<8x512xf32>,
    %c495_i32_58 = arith.constant 495 : i32
    %86 = tpu.dynamic_rotate %52 by %c495_i32_58 dim 1 : vector<8x512xf32>, i32 -> vector<8x512xf32>
    %87 = vector.broadcast %8 : vector<1x512xf32> to vector<8x512xf32>
    %88 = arith.mulf %86, %87 : vector<8x512xf32>
    %c64_59 = arith.constant 64 : index
    %c0_60 = arith.constant 0 : index
    %89 = vector.load %arg10[%c64_59, %c0_60] : memref<72x512xf32, #tpu.memory_space<vmem>>, vector<8x512xf32>
    tpu.vector_store %arg10[%c64_59, %c0_60], %88 {strides = array<i32>} : memref<72x512xf32, #tpu.memory_space<vmem>>, vector<8x512xf32>,
    %c0_61 = arith.constant 0 : index
    %c0_62 = arith.constant 0 : index
    %90 = vector.load %arg10[%c0_61, %c0_62] : memref<72x512xf32, #tpu.memory_space<vmem>>, vector<72x512xf32>
    %cst_63 = arith.constant dense<0.000000e+00> : vector<8x512xf32>
    %91 = tpu.matmul %54, %90, %cst_63 {dimension_numbers = #tpu.dot_dimension_numbers<[1], [0], [0], [1], [0, 0, 1, 1], [], []>} : vector<8x72xf32>, vector<72x512xf32>, vector<8x512xf32> -> vector<8x512xf32>
    %92 = vector.broadcast %56 : vector<8x1xf32> to vector<8x512xf32>
    %93 = arith.addf %91, %92 : vector<8x512xf32>
    %cst_64 = arith.constant 0.000000e+00 : f32
    %94 = vector.broadcast %cst_64 : f32 to vector<8x512xf32>
    %95 = arith.cmpf oge, %93, %94 : vector<8x512xf32>
    %cst_65 = arith.constant 1.000000e-01 : f32
    %96 = vector.broadcast %cst_65 : f32 to vector<8x512xf32>
    %97 = arith.mulf %96, %93 : vector<8x512xf32>
    %98 = arith.select %95, %93, %97 : vector<8x512xi1>, vector<8x512xf32>
    %c1_66 = arith.constant 1 : index
    %c0_67 = arith.constant 0 : index
    %c0_68 = arith.constant 0 : index
    %99 = vector.load %arg5[%c1_66, %c0_67, %c0_68] : memref<4x8x72xf32, #tpu.memory_space<vmem>>, vector<1x8x72xf32>
    %100 = vector.shape_cast %99 : vector<1x8x72xf32> to vector<8x72xf32>
    %c1_69 = arith.constant 1 : index
    %c0_70 = arith.constant 0 : index
    %c0_71 = arith.constant 0 : index
    %101 = vector.load %arg6[%c1_69, %c0_70, %c0_71] : memref<4x8x1xf32, #tpu.memory_space<vmem>>, vector<1x8x1xf32>
    %102 = vector.shape_cast %101 : vector<1x8x1xf32> to vector<8x1xf32>
    %c17_i32_72 = arith.constant 17 : i32
    %103 = tpu.dynamic_rotate %98 by %c17_i32_72 dim 1 : vector<8x512xf32>, i32 -> vector<8x512xf32>
    %104 = vector.broadcast %1 : vector<1x512xf32> to vector<8x512xf32>
    %105 = arith.mulf %103, %104 : vector<8x512xf32>
    %c0_73 = arith.constant 0 : index
    %c0_74 = arith.constant 0 : index
    %106 = vector.load %arg10[%c0_73, %c0_74] : memref<72x512xf32, #tpu.memory_space<vmem>>, vector<8x512xf32>
    tpu.vector_store %arg10[%c0_73, %c0_74], %105 {strides = array<i32>} : memref<72x512xf32, #tpu.memory_space<vmem>>, vector<8x512xf32>,
    %c16_i32_75 = arith.constant 16 : i32
    %107 = tpu.dynamic_rotate %98 by %c16_i32_75 dim 1 : vector<8x512xf32>, i32 -> vector<8x512xf32>
    %108 = vector.broadcast %2 : vector<1x512xf32> to vector<8x512xf32>
    %109 = arith.mulf %107, %108 : vector<8x512xf32>
    %c8_76 = arith.constant 8 : index
    %c0_77 = arith.constant 0 : index
    %110 = vector.load %arg10[%c8_76, %c0_77] : memref<72x512xf32, #tpu.memory_space<vmem>>, vector<8x512xf32>
    tpu.vector_store %arg10[%c8_76, %c0_77], %109 {strides = array<i32>} : memref<72x512xf32, #tpu.memory_space<vmem>>, vector<8x512xf32>,
    %c15_i32_78 = arith.constant 15 : i32
    %111 = tpu.dynamic_rotate %98 by %c15_i32_78 dim 1 : vector<8x512xf32>, i32 -> vector<8x512xf32>
    %112 = vector.broadcast %3 : vector<1x512xf32> to vector<8x512xf32>
    %113 = arith.mulf %111, %112 : vector<8x512xf32>
    %c16_79 = arith.constant 16 : index
    %c0_80 = arith.constant 0 : index
    %114 = vector.load %arg10[%c16_79, %c0_80] : memref<72x512xf32, #tpu.memory_space<vmem>>, vector<8x512xf32>
    tpu.vector_store %arg10[%c16_79, %c0_80], %113 {strides = array<i32>} : memref<72x512xf32, #tpu.memory_space<vmem>>, vector<8x512xf32>,
    %c1_i32_81 = arith.constant 1 : i32
    %115 = tpu.dynamic_rotate %98 by %c1_i32_81 dim 1 : vector<8x512xf32>, i32 -> vector<8x512xf32>
    %116 = vector.broadcast %4 : vector<1x512xf32> to vector<8x512xf32>
    %117 = arith.mulf %115, %116 : vector<8x512xf32>
    %c24_82 = arith.constant 24 : index
    %c0_83 = arith.constant 0 : index
    %118 = vector.load %arg10[%c24_82, %c0_83] : memref<72x512xf32, #tpu.memory_space<vmem>>, vector<8x512xf32>
    tpu.vector_store %arg10[%c24_82, %c0_83], %117 {strides = array<i32>} : memref<72x512xf32, #tpu.memory_space<vmem>>, vector<8x512xf32>,
    %c32_84 = arith.constant 32 : index
    %c0_85 = arith.constant 0 : index
    %119 = vector.load %arg10[%c32_84, %c0_85] : memref<72x512xf32, #tpu.memory_space<vmem>>, vector<8x512xf32>
    tpu.vector_store %arg10[%c32_84, %c0_85], %98 {strides = array<i32>} : memref<72x512xf32, #tpu.memory_space<vmem>>, vector<8x512xf32>,
    %c511_i32_86 = arith.constant 511 : i32
    %120 = tpu.dynamic_rotate %98 by %c511_i32_86 dim 1 : vector<8x512xf32>, i32 -> vector<8x512xf32>
    %121 = vector.broadcast %5 : vector<1x512xf32> to vector<8x512xf32>
    %122 = arith.mulf %120, %121 : vector<8x512xf32>
    %c40_87 = arith.constant 40 : index
    %c0_88 = arith.constant 0 : index
    %123 = vector.load %arg10[%c40_87, %c0_88] : memref<72x512xf32, #tpu.memory_space<vmem>>, vector<8x512xf32>
    tpu.vector_store %arg10[%c40_87, %c0_88], %122 {strides = array<i32>} : memref<72x512xf32, #tpu.memory_space<vmem>>, vector<8x512xf32>,
    %c497_i32_89 = arith.constant 497 : i32
    %124 = tpu.dynamic_rotate %98 by %c497_i32_89 dim 1 : vector<8x512xf32>, i32 -> vector<8x512xf32>
    %125 = vector.broadcast %6 : vector<1x512xf32> to vector<8x512xf32>
    %126 = arith.mulf %124, %125 : vector<8x512xf32>
    %c48_90 = arith.constant 48 : index
    %c0_91 = arith.constant 0 : index
    %127 = vector.load %arg10[%c48_90, %c0_91] : memref<72x512xf32, #tpu.memory_space<vmem>>, vector<8x512xf32>
    tpu.vector_store %arg10[%c48_90, %c0_91], %126 {strides = array<i32>} : memref<72x512xf32, #tpu.memory_space<vmem>>, vector<8x512xf32>,
    %c496_i32_92 = arith.constant 496 : i32
    %128 = tpu.dynamic_rotate %98 by %c496_i32_92 dim 1 : vector<8x512xf32>, i32 -> vector<8x512xf32>
    %129 = vector.broadcast %7 : vector<1x512xf32> to vector<8x512xf32>
    %130 = arith.mulf %128, %129 : vector<8x512xf32>
    %c56_93 = arith.constant 56 : index
    %c0_94 = arith.constant 0 : index
    %131 = vector.load %arg10[%c56_93, %c0_94] : memref<72x512xf32, #tpu.memory_space<vmem>>, vector<8x512xf32>
    tpu.vector_store %arg10[%c56_93, %c0_94], %130 {strides = array<i32>} : memref<72x512xf32, #tpu.memory_space<vmem>>, vector<8x512xf32>,
    %c495_i32_95 = arith.constant 495 : i32
    %132 = tpu.dynamic_rotate %98 by %c495_i32_95 dim 1 : vector<8x512xf32>, i32 -> vector<8x512xf32>
    %133 = vector.broadcast %8 : vector<1x512xf32> to vector<8x512xf32>
    %134 = arith.mulf %132, %133 : vector<8x512xf32>
    %c64_96 = arith.constant 64 : index
    %c0_97 = arith.constant 0 : index
    %135 = vector.load %arg10[%c64_96, %c0_97] : memref<72x512xf32, #tpu.memory_space<vmem>>, vector<8x512xf32>
    tpu.vector_store %arg10[%c64_96, %c0_97], %134 {strides = array<i32>} : memref<72x512xf32, #tpu.memory_space<vmem>>, vector<8x512xf32>,
    %c0_98 = arith.constant 0 : index
    %c0_99 = arith.constant 0 : index
    %136 = vector.load %arg10[%c0_98, %c0_99] : memref<72x512xf32, #tpu.memory_space<vmem>>, vector<72x512xf32>
    %cst_100 = arith.constant dense<0.000000e+00> : vector<8x512xf32>
    %137 = tpu.matmul %100, %136, %cst_100 {dimension_numbers = #tpu.dot_dimension_numbers<[1], [0], [0], [1], [0, 0, 1, 1], [], []>} : vector<8x72xf32>, vector<72x512xf32>, vector<8x512xf32> -> vector<8x512xf32>
    %138 = vector.broadcast %102 : vector<8x1xf32> to vector<8x512xf32>
    %139 = arith.addf %137, %138 : vector<8x512xf32>
    %c2_101 = arith.constant 2 : index
    %c0_102 = arith.constant 0 : index
    %c0_103 = arith.constant 0 : index
    %140 = vector.load %arg5[%c2_101, %c0_102, %c0_103] : memref<4x8x72xf32, #tpu.memory_space<vmem>>, vector<1x8x72xf32>
    %141 = vector.shape_cast %140 : vector<1x8x72xf32> to vector<8x72xf32>
    %c2_104 = arith.constant 2 : index
    %c0_105 = arith.constant 0 : index
    %c0_106 = arith.constant 0 : index
    %142 = vector.load %arg6[%c2_104, %c0_105, %c0_106] : memref<4x8x1xf32, #tpu.memory_space<vmem>>, vector<1x8x1xf32>
    %143 = vector.shape_cast %142 : vector<1x8x1xf32> to vector<8x1xf32>
    %c17_i32_107 = arith.constant 17 : i32
    %144 = tpu.dynamic_rotate %139 by %c17_i32_107 dim 1 : vector<8x512xf32>, i32 -> vector<8x512xf32>
    %145 = vector.broadcast %1 : vector<1x512xf32> to vector<8x512xf32>
    %146 = arith.mulf %144, %145 : vector<8x512xf32>
    %c0_108 = arith.constant 0 : index
    %c0_109 = arith.constant 0 : index
    %147 = vector.load %arg10[%c0_108, %c0_109] : memref<72x512xf32, #tpu.memory_space<vmem>>, vector<8x512xf32>
    tpu.vector_store %arg10[%c0_108, %c0_109], %146 {strides = array<i32>} : memref<72x512xf32, #tpu.memory_space<vmem>>, vector<8x512xf32>,
    %c16_i32_110 = arith.constant 16 : i32
    %148 = tpu.dynamic_rotate %139 by %c16_i32_110 dim 1 : vector<8x512xf32>, i32 -> vector<8x512xf32>
    %149 = vector.broadcast %2 : vector<1x512xf32> to vector<8x512xf32>
    %150 = arith.mulf %148, %149 : vector<8x512xf32>
    %c8_111 = arith.constant 8 : index
    %c0_112 = arith.constant 0 : index
    %151 = vector.load %arg10[%c8_111, %c0_112] : memref<72x512xf32, #tpu.memory_space<vmem>>, vector<8x512xf32>
    tpu.vector_store %arg10[%c8_111, %c0_112], %150 {strides = array<i32>} : memref<72x512xf32, #tpu.memory_space<vmem>>, vector<8x512xf32>,
    %c15_i32_113 = arith.constant 15 : i32
    %152 = tpu.dynamic_rotate %139 by %c15_i32_113 dim 1 : vector<8x512xf32>, i32 -> vector<8x512xf32>
    %153 = vector.broadcast %3 : vector<1x512xf32> to vector<8x512xf32>
    %154 = arith.mulf %152, %153 : vector<8x512xf32>
    %c16_114 = arith.constant 16 : index
    %c0_115 = arith.constant 0 : index
    %155 = vector.load %arg10[%c16_114, %c0_115] : memref<72x512xf32, #tpu.memory_space<vmem>>, vector<8x512xf32>
    tpu.vector_store %arg10[%c16_114, %c0_115], %154 {strides = array<i32>} : memref<72x512xf32, #tpu.memory_space<vmem>>, vector<8x512xf32>,
    %c1_i32_116 = arith.constant 1 : i32
    %156 = tpu.dynamic_rotate %139 by %c1_i32_116 dim 1 : vector<8x512xf32>, i32 -> vector<8x512xf32>
    %157 = vector.broadcast %4 : vector<1x512xf32> to vector<8x512xf32>
    %158 = arith.mulf %156, %157 : vector<8x512xf32>
    %c24_117 = arith.constant 24 : index
    %c0_118 = arith.constant 0 : index
    %159 = vector.load %arg10[%c24_117, %c0_118] : memref<72x512xf32, #tpu.memory_space<vmem>>, vector<8x512xf32>
    tpu.vector_store %arg10[%c24_117, %c0_118], %158 {strides = array<i32>} : memref<72x512xf32, #tpu.memory_space<vmem>>, vector<8x512xf32>,
    %c32_119 = arith.constant 32 : index
    %c0_120 = arith.constant 0 : index
    %160 = vector.load %arg10[%c32_119, %c0_120] : memref<72x512xf32, #tpu.memory_space<vmem>>, vector<8x512xf32>
    tpu.vector_store %arg10[%c32_119, %c0_120], %139 {strides = array<i32>} : memref<72x512xf32, #tpu.memory_space<vmem>>, vector<8x512xf32>,
    %c511_i32_121 = arith.constant 511 : i32
    %161 = tpu.dynamic_rotate %139 by %c511_i32_121 dim 1 : vector<8x512xf32>, i32 -> vector<8x512xf32>
    %162 = vector.broadcast %5 : vector<1x512xf32> to vector<8x512xf32>
    %163 = arith.mulf %161, %162 : vector<8x512xf32>
    %c40_122 = arith.constant 40 : index
    %c0_123 = arith.constant 0 : index
    %164 = vector.load %arg10[%c40_122, %c0_123] : memref<72x512xf32, #tpu.memory_space<vmem>>, vector<8x512xf32>
    tpu.vector_store %arg10[%c40_122, %c0_123], %163 {strides = array<i32>} : memref<72x512xf32, #tpu.memory_space<vmem>>, vector<8x512xf32>,
    %c497_i32_124 = arith.constant 497 : i32
    %165 = tpu.dynamic_rotate %139 by %c497_i32_124 dim 1 : vector<8x512xf32>, i32 -> vector<8x512xf32>
    %166 = vector.broadcast %6 : vector<1x512xf32> to vector<8x512xf32>
    %167 = arith.mulf %165, %166 : vector<8x512xf32>
    %c48_125 = arith.constant 48 : index
    %c0_126 = arith.constant 0 : index
    %168 = vector.load %arg10[%c48_125, %c0_126] : memref<72x512xf32, #tpu.memory_space<vmem>>, vector<8x512xf32>
    tpu.vector_store %arg10[%c48_125, %c0_126], %167 {strides = array<i32>} : memref<72x512xf32, #tpu.memory_space<vmem>>, vector<8x512xf32>,
    %c496_i32_127 = arith.constant 496 : i32
    %169 = tpu.dynamic_rotate %139 by %c496_i32_127 dim 1 : vector<8x512xf32>, i32 -> vector<8x512xf32>
    %170 = vector.broadcast %7 : vector<1x512xf32> to vector<8x512xf32>
    %171 = arith.mulf %169, %170 : vector<8x512xf32>
    %c56_128 = arith.constant 56 : index
    %c0_129 = arith.constant 0 : index
    %172 = vector.load %arg10[%c56_128, %c0_129] : memref<72x512xf32, #tpu.memory_space<vmem>>, vector<8x512xf32>
    tpu.vector_store %arg10[%c56_128, %c0_129], %171 {strides = array<i32>} : memref<72x512xf32, #tpu.memory_space<vmem>>, vector<8x512xf32>,
    %c495_i32_130 = arith.constant 495 : i32
    %173 = tpu.dynamic_rotate %139 by %c495_i32_130 dim 1 : vector<8x512xf32>, i32 -> vector<8x512xf32>
    %174 = vector.broadcast %8 : vector<1x512xf32> to vector<8x512xf32>
    %175 = arith.mulf %173, %174 : vector<8x512xf32>
    %c64_131 = arith.constant 64 : index
    %c0_132 = arith.constant 0 : index
    %176 = vector.load %arg10[%c64_131, %c0_132] : memref<72x512xf32, #tpu.memory_space<vmem>>, vector<8x512xf32>
    tpu.vector_store %arg10[%c64_131, %c0_132], %175 {strides = array<i32>} : memref<72x512xf32, #tpu.memory_space<vmem>>, vector<8x512xf32>,
    %c0_133 = arith.constant 0 : index
    %c0_134 = arith.constant 0 : index
    %177 = vector.load %arg10[%c0_133, %c0_134] : memref<72x512xf32, #tpu.memory_space<vmem>>, vector<72x512xf32>
    %cst_135 = arith.constant dense<0.000000e+00> : vector<8x512xf32>
    %178 = tpu.matmul %141, %177, %cst_135 {dimension_numbers = #tpu.dot_dimension_numbers<[1], [0], [0], [1], [0, 0, 1, 1], [], []>} : vector<8x72xf32>, vector<72x512xf32>, vector<8x512xf32> -> vector<8x512xf32>
    %179 = vector.broadcast %143 : vector<8x1xf32> to vector<8x512xf32>
    %180 = arith.addf %178, %179 : vector<8x512xf32>
    %cst_136 = arith.constant 0.000000e+00 : f32
    %181 = vector.broadcast %cst_136 : f32 to vector<8x512xf32>
    %182 = arith.cmpf oge, %180, %181 : vector<8x512xf32>
    %cst_137 = arith.constant 1.000000e-01 : f32
    %183 = vector.broadcast %cst_137 : f32 to vector<8x512xf32>
    %184 = arith.mulf %183, %180 : vector<8x512xf32>
    %185 = arith.select %182, %180, %184 : vector<8x512xi1>, vector<8x512xf32>
    %c3_138 = arith.constant 3 : index
    %c0_139 = arith.constant 0 : index
    %c0_140 = arith.constant 0 : index
    %186 = vector.load %arg5[%c3_138, %c0_139, %c0_140] : memref<4x8x72xf32, #tpu.memory_space<vmem>>, vector<1x8x72xf32>
    %187 = vector.shape_cast %186 : vector<1x8x72xf32> to vector<8x72xf32>
    %c3_141 = arith.constant 3 : index
    %c0_142 = arith.constant 0 : index
    %c0_143 = arith.constant 0 : index
    %188 = vector.load %arg6[%c3_141, %c0_142, %c0_143] : memref<4x8x1xf32, #tpu.memory_space<vmem>>, vector<1x8x1xf32>
    %189 = vector.shape_cast %188 : vector<1x8x1xf32> to vector<8x1xf32>
    %c17_i32_144 = arith.constant 17 : i32
    %190 = tpu.dynamic_rotate %185 by %c17_i32_144 dim 1 : vector<8x512xf32>, i32 -> vector<8x512xf32>
    %191 = vector.broadcast %1 : vector<1x512xf32> to vector<8x512xf32>
    %192 = arith.mulf %190, %191 : vector<8x512xf32>
    %c0_145 = arith.constant 0 : index
    %c0_146 = arith.constant 0 : index
    %193 = vector.load %arg10[%c0_145, %c0_146] : memref<72x512xf32, #tpu.memory_space<vmem>>, vector<8x512xf32>
    tpu.vector_store %arg10[%c0_145, %c0_146], %192 {strides = array<i32>} : memref<72x512xf32, #tpu.memory_space<vmem>>, vector<8x512xf32>,
    %c16_i32_147 = arith.constant 16 : i32
    %194 = tpu.dynamic_rotate %185 by %c16_i32_147 dim 1 : vector<8x512xf32>, i32 -> vector<8x512xf32>
    %195 = vector.broadcast %2 : vector<1x512xf32> to vector<8x512xf32>
    %196 = arith.mulf %194, %195 : vector<8x512xf32>
    %c8_148 = arith.constant 8 : index
    %c0_149 = arith.constant 0 : index
    %197 = vector.load %arg10[%c8_148, %c0_149] : memref<72x512xf32, #tpu.memory_space<vmem>>, vector<8x512xf32>
    tpu.vector_store %arg10[%c8_148, %c0_149], %196 {strides = array<i32>} : memref<72x512xf32, #tpu.memory_space<vmem>>, vector<8x512xf32>,
    %c15_i32_150 = arith.constant 15 : i32
    %198 = tpu.dynamic_rotate %185 by %c15_i32_150 dim 1 : vector<8x512xf32>, i32 -> vector<8x512xf32>
    %199 = vector.broadcast %3 : vector<1x512xf32> to vector<8x512xf32>
    %200 = arith.mulf %198, %199 : vector<8x512xf32>
    %c16_151 = arith.constant 16 : index
    %c0_152 = arith.constant 0 : index
    %201 = vector.load %arg10[%c16_151, %c0_152] : memref<72x512xf32, #tpu.memory_space<vmem>>, vector<8x512xf32>
    tpu.vector_store %arg10[%c16_151, %c0_152], %200 {strides = array<i32>} : memref<72x512xf32, #tpu.memory_space<vmem>>, vector<8x512xf32>,
    %c1_i32_153 = arith.constant 1 : i32
    %202 = tpu.dynamic_rotate %185 by %c1_i32_153 dim 1 : vector<8x512xf32>, i32 -> vector<8x512xf32>
    %203 = vector.broadcast %4 : vector<1x512xf32> to vector<8x512xf32>
    %204 = arith.mulf %202, %203 : vector<8x512xf32>
    %c24_154 = arith.constant 24 : index
    %c0_155 = arith.constant 0 : index
    %205 = vector.load %arg10[%c24_154, %c0_155] : memref<72x512xf32, #tpu.memory_space<vmem>>, vector<8x512xf32>
    tpu.vector_store %arg10[%c24_154, %c0_155], %204 {strides = array<i32>} : memref<72x512xf32, #tpu.memory_space<vmem>>, vector<8x512xf32>,
    %c32_156 = arith.constant 32 : index
    %c0_157 = arith.constant 0 : index
    %206 = vector.load %arg10[%c32_156, %c0_157] : memref<72x512xf32, #tpu.memory_space<vmem>>, vector<8x512xf32>
    tpu.vector_store %arg10[%c32_156, %c0_157], %185 {strides = array<i32>} : memref<72x512xf32, #tpu.memory_space<vmem>>, vector<8x512xf32>,
    %c511_i32_158 = arith.constant 511 : i32
    %207 = tpu.dynamic_rotate %185 by %c511_i32_158 dim 1 : vector<8x512xf32>, i32 -> vector<8x512xf32>
    %208 = vector.broadcast %5 : vector<1x512xf32> to vector<8x512xf32>
    %209 = arith.mulf %207, %208 : vector<8x512xf32>
    %c40_159 = arith.constant 40 : index
    %c0_160 = arith.constant 0 : index
    %210 = vector.load %arg10[%c40_159, %c0_160] : memref<72x512xf32, #tpu.memory_space<vmem>>, vector<8x512xf32>
    tpu.vector_store %arg10[%c40_159, %c0_160], %209 {strides = array<i32>} : memref<72x512xf32, #tpu.memory_space<vmem>>, vector<8x512xf32>,
    %c497_i32_161 = arith.constant 497 : i32
    %211 = tpu.dynamic_rotate %185 by %c497_i32_161 dim 1 : vector<8x512xf32>, i32 -> vector<8x512xf32>
    %212 = vector.broadcast %6 : vector<1x512xf32> to vector<8x512xf32>
    %213 = arith.mulf %211, %212 : vector<8x512xf32>
    %c48_162 = arith.constant 48 : index
    %c0_163 = arith.constant 0 : index
    %214 = vector.load %arg10[%c48_162, %c0_163] : memref<72x512xf32, #tpu.memory_space<vmem>>, vector<8x512xf32>
    tpu.vector_store %arg10[%c48_162, %c0_163], %213 {strides = array<i32>} : memref<72x512xf32, #tpu.memory_space<vmem>>, vector<8x512xf32>,
    %c496_i32_164 = arith.constant 496 : i32
    %215 = tpu.dynamic_rotate %185 by %c496_i32_164 dim 1 : vector<8x512xf32>, i32 -> vector<8x512xf32>
    %216 = vector.broadcast %7 : vector<1x512xf32> to vector<8x512xf32>
    %217 = arith.mulf %215, %216 : vector<8x512xf32>
    %c56_165 = arith.constant 56 : index
    %c0_166 = arith.constant 0 : index
    %218 = vector.load %arg10[%c56_165, %c0_166] : memref<72x512xf32, #tpu.memory_space<vmem>>, vector<8x512xf32>
    tpu.vector_store %arg10[%c56_165, %c0_166], %217 {strides = array<i32>} : memref<72x512xf32, #tpu.memory_space<vmem>>, vector<8x512xf32>,
    %c495_i32_167 = arith.constant 495 : i32
    %219 = tpu.dynamic_rotate %185 by %c495_i32_167 dim 1 : vector<8x512xf32>, i32 -> vector<8x512xf32>
    %220 = vector.broadcast %8 : vector<1x512xf32> to vector<8x512xf32>
    %221 = arith.mulf %219, %220 : vector<8x512xf32>
    %c64_168 = arith.constant 64 : index
    %c0_169 = arith.constant 0 : index
    %222 = vector.load %arg10[%c64_168, %c0_169] : memref<72x512xf32, #tpu.memory_space<vmem>>, vector<8x512xf32>
    tpu.vector_store %arg10[%c64_168, %c0_169], %221 {strides = array<i32>} : memref<72x512xf32, #tpu.memory_space<vmem>>, vector<8x512xf32>,
    %c0_170 = arith.constant 0 : index
    %c0_171 = arith.constant 0 : index
    %223 = vector.load %arg10[%c0_170, %c0_171] : memref<72x512xf32, #tpu.memory_space<vmem>>, vector<72x512xf32>
    %cst_172 = arith.constant dense<0.000000e+00> : vector<8x512xf32>
    %224 = tpu.matmul %187, %223, %cst_172 {dimension_numbers = #tpu.dot_dimension_numbers<[1], [0], [0], [1], [0, 0, 1, 1], [], []>} : vector<8x72xf32>, vector<72x512xf32>, vector<8x512xf32> -> vector<8x512xf32>
    %225 = vector.broadcast %189 : vector<8x1xf32> to vector<8x512xf32>
    %226 = arith.addf %224, %225 : vector<8x512xf32>
    %cst_173 = arith.constant 0.000000e+00 : f32
    %227 = vector.broadcast %cst_173 : f32 to vector<8x512xf32>
    %228 = arith.cmpf oge, %226, %227 : vector<8x512xf32>
    %cst_174 = arith.constant 1.000000e-01 : f32
    %229 = vector.broadcast %cst_174 : f32 to vector<8x512xf32>
    %230 = arith.mulf %229, %226 : vector<8x512xf32>
    %231 = arith.select %228, %226, %230 : vector<8x512xi1>, vector<8x512xf32>
    %c0_175 = arith.constant 0 : index
    %c0_176 = arith.constant 0 : index
    %232 = vector.load %arg7[%c0_175, %c0_176] : memref<8x72xf32, #tpu.memory_space<vmem>>, vector<8x72xf32>
    %c0_177 = arith.constant 0 : index
    %c0_178 = arith.constant 0 : index
    %233 = vector.load %arg8[%c0_177, %c0_178] : memref<8x1xf32, #tpu.memory_space<vmem>>, vector<8x1xf32>
    %c17_i32_179 = arith.constant 17 : i32
    %234 = tpu.dynamic_rotate %231 by %c17_i32_179 dim 1 : vector<8x512xf32>, i32 -> vector<8x512xf32>
    %235 = vector.broadcast %1 : vector<1x512xf32> to vector<8x512xf32>
    %236 = arith.mulf %234, %235 : vector<8x512xf32>
    %c0_180 = arith.constant 0 : index
    %c0_181 = arith.constant 0 : index
    %237 = vector.load %arg10[%c0_180, %c0_181] : memref<72x512xf32, #tpu.memory_space<vmem>>, vector<8x512xf32>
    tpu.vector_store %arg10[%c0_180, %c0_181], %236 {strides = array<i32>} : memref<72x512xf32, #tpu.memory_space<vmem>>, vector<8x512xf32>,
    %c16_i32_182 = arith.constant 16 : i32
    %238 = tpu.dynamic_rotate %231 by %c16_i32_182 dim 1 : vector<8x512xf32>, i32 -> vector<8x512xf32>
    %239 = vector.broadcast %2 : vector<1x512xf32> to vector<8x512xf32>
    %240 = arith.mulf %238, %239 : vector<8x512xf32>
    %c8_183 = arith.constant 8 : index
    %c0_184 = arith.constant 0 : index
    %241 = vector.load %arg10[%c8_183, %c0_184] : memref<72x512xf32, #tpu.memory_space<vmem>>, vector<8x512xf32>
    tpu.vector_store %arg10[%c8_183, %c0_184], %240 {strides = array<i32>} : memref<72x512xf32, #tpu.memory_space<vmem>>, vector<8x512xf32>,
    %c15_i32_185 = arith.constant 15 : i32
    %242 = tpu.dynamic_rotate %231 by %c15_i32_185 dim 1 : vector<8x512xf32>, i32 -> vector<8x512xf32>
    %243 = vector.broadcast %3 : vector<1x512xf32> to vector<8x512xf32>
    %244 = arith.mulf %242, %243 : vector<8x512xf32>
    %c16_186 = arith.constant 16 : index
    %c0_187 = arith.constant 0 : index
    %245 = vector.load %arg10[%c16_186, %c0_187] : memref<72x512xf32, #tpu.memory_space<vmem>>, vector<8x512xf32>
    tpu.vector_store %arg10[%c16_186, %c0_187], %244 {strides = array<i32>} : memref<72x512xf32, #tpu.memory_space<vmem>>, vector<8x512xf32>,
    %c1_i32_188 = arith.constant 1 : i32
    %246 = tpu.dynamic_rotate %231 by %c1_i32_188 dim 1 : vector<8x512xf32>, i32 -> vector<8x512xf32>
    %247 = vector.broadcast %4 : vector<1x512xf32> to vector<8x512xf32>
    %248 = arith.mulf %246, %247 : vector<8x512xf32>
    %c24_189 = arith.constant 24 : index
    %c0_190 = arith.constant 0 : index
    %249 = vector.load %arg10[%c24_189, %c0_190] : memref<72x512xf32, #tpu.memory_space<vmem>>, vector<8x512xf32>
    tpu.vector_store %arg10[%c24_189, %c0_190], %248 {strides = array<i32>} : memref<72x512xf32, #tpu.memory_space<vmem>>, vector<8x512xf32>,
    %c32_191 = arith.constant 32 : index
    %c0_192 = arith.constant 0 : index
    %250 = vector.load %arg10[%c32_191, %c0_192] : memref<72x512xf32, #tpu.memory_space<vmem>>, vector<8x512xf32>
    tpu.vector_store %arg10[%c32_191, %c0_192], %231 {strides = array<i32>} : memref<72x512xf32, #tpu.memory_space<vmem>>, vector<8x512xf32>,
    %c511_i32_193 = arith.constant 511 : i32
    %251 = tpu.dynamic_rotate %231 by %c511_i32_193 dim 1 : vector<8x512xf32>, i32 -> vector<8x512xf32>
    %252 = vector.broadcast %5 : vector<1x512xf32> to vector<8x512xf32>
    %253 = arith.mulf %251, %252 : vector<8x512xf32>
    %c40_194 = arith.constant 40 : index
    %c0_195 = arith.constant 0 : index
    %254 = vector.load %arg10[%c40_194, %c0_195] : memref<72x512xf32, #tpu.memory_space<vmem>>, vector<8x512xf32>
    tpu.vector_store %arg10[%c40_194, %c0_195], %253 {strides = array<i32>} : memref<72x512xf32, #tpu.memory_space<vmem>>, vector<8x512xf32>,
    %c497_i32_196 = arith.constant 497 : i32
    %255 = tpu.dynamic_rotate %231 by %c497_i32_196 dim 1 : vector<8x512xf32>, i32 -> vector<8x512xf32>
    %256 = vector.broadcast %6 : vector<1x512xf32> to vector<8x512xf32>
    %257 = arith.mulf %255, %256 : vector<8x512xf32>
    %c48_197 = arith.constant 48 : index
    %c0_198 = arith.constant 0 : index
    %258 = vector.load %arg10[%c48_197, %c0_198] : memref<72x512xf32, #tpu.memory_space<vmem>>, vector<8x512xf32>
    tpu.vector_store %arg10[%c48_197, %c0_198], %257 {strides = array<i32>} : memref<72x512xf32, #tpu.memory_space<vmem>>, vector<8x512xf32>,
    %c496_i32_199 = arith.constant 496 : i32
    %259 = tpu.dynamic_rotate %231 by %c496_i32_199 dim 1 : vector<8x512xf32>, i32 -> vector<8x512xf32>
    %260 = vector.broadcast %7 : vector<1x512xf32> to vector<8x512xf32>
    %261 = arith.mulf %259, %260 : vector<8x512xf32>
    %c56_200 = arith.constant 56 : index
    %c0_201 = arith.constant 0 : index
    %262 = vector.load %arg10[%c56_200, %c0_201] : memref<72x512xf32, #tpu.memory_space<vmem>>, vector<8x512xf32>
    tpu.vector_store %arg10[%c56_200, %c0_201], %261 {strides = array<i32>} : memref<72x512xf32, #tpu.memory_space<vmem>>, vector<8x512xf32>,
    %c495_i32_202 = arith.constant 495 : i32
    %263 = tpu.dynamic_rotate %231 by %c495_i32_202 dim 1 : vector<8x512xf32>, i32 -> vector<8x512xf32>
    %264 = vector.broadcast %8 : vector<1x512xf32> to vector<8x512xf32>
    %265 = arith.mulf %263, %264 : vector<8x512xf32>
    %c64_203 = arith.constant 64 : index
    %c0_204 = arith.constant 0 : index
    %266 = vector.load %arg10[%c64_203, %c0_204] : memref<72x512xf32, #tpu.memory_space<vmem>>, vector<8x512xf32>
    tpu.vector_store %arg10[%c64_203, %c0_204], %265 {strides = array<i32>} : memref<72x512xf32, #tpu.memory_space<vmem>>, vector<8x512xf32>,
    %c0_205 = arith.constant 0 : index
    %c0_206 = arith.constant 0 : index
    %267 = vector.load %arg10[%c0_205, %c0_206] : memref<72x512xf32, #tpu.memory_space<vmem>>, vector<72x512xf32>
    %cst_207 = arith.constant dense<0.000000e+00> : vector<8x512xf32>
    %268 = tpu.matmul %232, %267, %cst_207 {dimension_numbers = #tpu.dot_dimension_numbers<[1], [0], [0], [1], [0, 0, 1, 1], [], []>} : vector<8x72xf32>, vector<72x512xf32>, vector<8x512xf32> -> vector<8x512xf32>
    %269 = vector.broadcast %233 : vector<8x1xf32> to vector<8x512xf32>
    %270 = arith.addf %268, %269 : vector<8x512xf32>
    %271 = arith.negf %270 : vector<8x512xf32>
    %272 = math.exp %271 : vector<8x512xf32>
    %cst_208 = arith.constant 1.000000e+00 : f32
    %273 = vector.broadcast %cst_208 : f32 to vector<8x512xf32>
    %274 = arith.addf %273, %272 : vector<8x512xf32>
    %275 = arith.divf %273, %274 : vector<8x512xf32>
    %276 = vector.extract_strided_slice %275 {offsets = [0, 0], sizes = [4, 512], strides = [1, 1]} : vector<8x512xf32> to vector<4x512xf32>
    %277 = vector.extract_strided_slice %0 {offsets = [0, 0], sizes = [4, 512], strides = [1, 1]} : vector<8x512xf32> to vector<4x512xf32>
    %278 = arith.mulf %276, %277 : vector<4x512xf32>
    %c0_209 = arith.constant 0 : index
    %c0_210 = arith.constant 0 : index
    %279 = vector.load %arg9[%c0_209, %c0_210] : memref<4x512xf32, #tpu.memory_space<vmem>>, vector<4x512xf32>
    tpu.vector_store %arg9[%c0_209, %c0_210], %278 {strides = array<i32>} : memref<4x512xf32, #tpu.memory_space<vmem>>, vector<4x512xf32>,
    return
  }
  func.func @transform_0(%arg0: i32) -> (i32, i32) {
    %c0_i32 = arith.constant 0 : i32
    %c0_i32_0 = arith.constant 0 : i32
    return %c0_i32, %arg0 : i32, i32
  }
  func.func @transform_1(%arg0: i32) -> (i32, i32) {
    %c0_i32 = arith.constant 0 : i32
    %c0_i32_0 = arith.constant 0 : i32
    %c0_i32_1 = arith.constant 0 : i32
    return %c0_i32, %c0_i32_0 : i32, i32
  }
  func.func @transform_2(%arg0: i32) -> (i32, i32) {
    %c0_i32 = arith.constant 0 : i32
    %c0_i32_0 = arith.constant 0 : i32
    %c0_i32_1 = arith.constant 0 : i32
    return %c0_i32, %c0_i32_0 : i32, i32
  }
  func.func @transform_3(%arg0: i32) -> (i32, i32) {
    %c0_i32 = arith.constant 0 : i32
    %c0_i32_0 = arith.constant 0 : i32
    %c0_i32_1 = arith.constant 0 : i32
    return %c0_i32, %c0_i32_0 : i32, i32
  }
  func.func @transform_4(%arg0: i32) -> (i32, i32, i32) {
    %c0_i32 = arith.constant 0 : i32
    %c0_i32_0 = arith.constant 0 : i32
    %c0_i32_1 = arith.constant 0 : i32
    %c0_i32_2 = arith.constant 0 : i32
    return %c0_i32, %c0_i32_0, %c0_i32_1 : i32, i32, i32
  }
  func.func @transform_5(%arg0: i32) -> (i32, i32, i32) {
    %c0_i32 = arith.constant 0 : i32
    %c0_i32_0 = arith.constant 0 : i32
    %c0_i32_1 = arith.constant 0 : i32
    %c0_i32_2 = arith.constant 0 : i32
    return %c0_i32, %c0_i32_0, %c0_i32_1 : i32, i32, i32
  }
  func.func @transform_6(%arg0: i32) -> (i32, i32) {
    %c0_i32 = arith.constant 0 : i32
    %c0_i32_0 = arith.constant 0 : i32
    %c0_i32_1 = arith.constant 0 : i32
    return %c0_i32, %c0_i32_0 : i32, i32
  }
  func.func @transform_7(%arg0: i32) -> (i32, i32) {
    %c0_i32 = arith.constant 0 : i32
    %c0_i32_0 = arith.constant 0 : i32
    %c0_i32_1 = arith.constant 0 : i32
    return %c0_i32, %c0_i32_0 : i32, i32
  }
  func.func @transform_8(%arg0: i32) -> (i32, i32) {
    %c0_i32 = arith.constant 0 : i32
    %c0_i32_0 = arith.constant 0 : i32
    return %c0_i32, %arg0 : i32, i32
  }
}

</mosaic_0001>

<bundles_post_ra>
// kernel: hfab_forward.1
= control target key start
LH: loop header
LB: loop body
LE: loop exit
PB: predicated region body
PF: predicated region fallthrough
CT: control target
= control target key end

     0   :  { %s2688_s9 = smov 17   ;;  %s2689_s14 = smov 16   ;;  %v2695_v4 = vmov 0.0   ;;  %v2696_v5 = vmov 0   ;;  %v58_v7 = vlaneseq  ;;  %vm433_vm8 = vcmask 588800   ;;  %s4003_s0 = inlined_call_operand.vmem [shape: f32[8,512], index: 0, kind: input, shape index: {}]   ;;  %s4004_s3 = inlined_call_operand.vmem [shape: f32[8,1], index: 3, kind: input, shape index: {}]   ;;  %s4005_s1 = inlined_call_operand.vmem [shape: f32[9,512], index: 1, kind: input, shape index: {}]   ;;  %s4006_s2 = inlined_call_operand.vmem [shape: f32[8,72], index: 2, kind: input, shape index: {}]   ;;  %s4007_s5 = inlined_call_operand.vmem [shape: f32[4,8,1], index: 5, kind: input, shape index: {}]   ;;  %s4008_s4 = inlined_call_operand.vmem [shape: f32[4,8,72], index: 4, kind: input, shape index: {}]   ;;  %s4009_s7 = inlined_call_operand.vmem [shape: f32[8,1], index: 7, kind: input, shape index: {}]   ;;  %s4010_s6 = inlined_call_operand.vmem [shape: f32[8,72], index: 6, kind: input, shape index: {}]   ;;  %s4011_s8 = inlined_call_operand.vmem [shape: f32[4,512], index: 8, kind: output, shape index: {}]  }
   0x1   :  { %v2746_v0 = vld [vmem:[%s4003_s0 + $0x10] sm:$0xff]  ;;  %v2751_v1 = vld [vmem:[%s4003_s0] sm:$0xff]  ;;  %v2760_v2 = vld [vmem:[%s4003_s0 + $0x18] sm:$0xff]  ;;  %s2690_s15 = smov 15   ;;  %s2691_s16 = smov 1   ;;  %501 = vmatprep.mubr.f32.mxu0 %v2695_v4  ;;  %572 = vmatprep.mubr.f32.mxu1 %v2695_v4 }
   0x2   :  { %54 = vrot.lane.b32.xlu1 %v2746_v0, %s2688_s9  ;;  %50 = vrot.lane.b32.xlu0 %v2751_v1, %s2688_s9  ;;  %v2765_v3 = vld [vmem:[%s4003_s0 + $0x8] sm:$0xff]  ;;  %s2692_s17 = smov 127   ;;  %s2693_s18 = smov 113   ;;  %v49_v6 = vld [vmem:[%s4004_s3] sm:$0xff]  ;;  %v67_v8 = vshrl.u32 %v58_v7, 7  ;;  %v2832_v11 = vand.u32 127, %v58_v7 }
   0x3   :  { %s2694_s19 = smov 112   ;;  %2666 = vset.pattern.permute.xlu0 %v2696_v5  ;;  %2667 = vset.pattern.permute.xlu1 %v2696_v5  ;;  %s2697_s20 = smov 111   ;;  %v33_v13 = vld [vmem:[%s4005_s1] ss:$8 sm:$0xf] }
   0x4   :  { %v2834_v12 = vsub.s32 1, %v67_v8  ;;  %v2435_v14 = vld [vmem:[%s4005_s1 + $0x1] ss:$8 sm:$0xf]  ;;  %vm60_vm0 = vcmp.lt.s32.totalorder %v2832_v11, 17  ;;  %v2843_v17 = vsub.s32 0, %v67_v8 }
   0x5   :  { %v2845_v18 = vsub.s32 3, %v67_v8  ;;  %v2847_v19 = vsub.s32 2, %v67_v8  ;;  %vm102_vm1 = vcmp.lt.s32.totalorder %v2832_v11, 16  ;;  %v2436_v54 = vld [vmem:[%s4005_s1 + $0x2] ss:$8 sm:$0xf] }
   0x6   :  { %56 = vrot.lane.b32.xlu1 %v2760_v2, %s2688_s9  ;;  %52 = vrot.lane.b32.xlu0 %v2765_v3, %s2688_s9  ;;  %v2851_v20 = vrot.slane %v33_v13, %v2834_v12  ;;  %v2854_v21 = vrot.slane %v2435_v14, %v2834_v12  ;;  %v2859_v25 = vrot.slane %v33_v13, %v2843_v17  ;;  %v2437_v55 = vld [vmem:[%s4005_s1 + $0x3] ss:$8 sm:$0xf]  ;;  %vm144_vm2 = vcmp.lt.s32.totalorder %v2832_v11, 15 }
   0x7   :  { %v2862_v26 = vrot.slane %v2435_v14, %v2843_v17  ;;  %v2865_v27 = vrot.slane %v33_v13, %v2845_v18  ;;  %v2872_v30 = vrot.slane %v2435_v14, %v2845_v18  ;;  %v2875_v31 = vrot.slane %v33_v13, %v2847_v19 }
   0x8   :  { %v2882_v35 = vrot.slane %v2435_v14, %v2847_v19  ;;  %vm186_vm3 = vcmp.lt.s32.totalorder %v2832_v11, 1  ;;  %v2907_v58 = vrot.slane %v2436_v54, %v2834_v12  ;;  %v2910_v59 = vrot.slane %v2437_v55, %v2834_v12 }
   0x9   :  { %v2915_v61 = vrot.slane %v2436_v54, %v2843_v17  ;;  %v2918_v62 = vrot.slane %v2436_v54, %v2847_v19  ;;  %v2921_v63 = vrot.slane %v2436_v54, %v2845_v18  ;;  %vm232_vm4 = vcmp.lt.s32.totalorder %v2832_v11, 127 }
   0xa   :  { %96 = vrot.lane.b32.xlu1 %v2765_v3, %s2689_s14  ;;  %94 = vrot.lane.b32.xlu0 %v2751_v1, %s2689_s14  ;;  %vm316_vm5 = vcmp.lt.s32.totalorder %v2832_v11, 112  ;;  %vm274_vm6 = vcmp.lt.s32.totalorder %v2832_v11, 113  ;;  %vm358_vm7 = vcmp.lt.s32.totalorder %v2832_v11, 111 }
   0xe   :  { %100 = vrot.lane.b32.xlu1 %v2760_v2, %s2689_s14  ;;  %98 = vrot.lane.b32.xlu0 %v2746_v0, %s2689_s14 }
  0x12   :  { %138 = vrot.lane.b32.xlu1 %v2765_v3, %s2690_s15  ;;  %136 = vrot.lane.b32.xlu0 %v2751_v1, %s2690_s15 }
  0x16   :  { %142 = vrot.lane.b32.xlu1 %v2760_v2, %s2690_s15  ;;  %140 = vrot.lane.b32.xlu0 %v2746_v0, %s2690_s15 }
  0x1a   :  { %180 = vrot.lane.b32.xlu1 %v2765_v3, %s2691_s16  ;;  %178 = vrot.lane.b32.xlu0 %v2751_v1, %s2691_s16 }
  0x1e   :  { %184 = vrot.lane.b32.xlu1 %v2760_v2, %s2691_s16  ;;  %182 = vrot.lane.b32.xlu0 %v2746_v0, %s2691_s16 }
  0x22   :  { %226 = vrot.lane.b32.xlu1 %v2765_v3, %s2692_s17  ;;  %224 = vrot.lane.b32.xlu0 %v2751_v1, %s2692_s17 }
  0x26   :  { %230 = vrot.lane.b32.xlu1 %v2760_v2, %s2692_s17  ;;  %228 = vrot.lane.b32.xlu0 %v2746_v0, %s2692_s17 }
  0x2a   :  { %268 = vrot.lane.b32.xlu1 %v2765_v3, %s2693_s18  ;;  %266 = vrot.lane.b32.xlu0 %v2751_v1, %s2693_s18 }
  0x2e   :  { %272 = vrot.lane.b32.xlu1 %v2760_v2, %s2693_s18  ;;  %270 = vrot.lane.b32.xlu0 %v2746_v0, %s2693_s18 }
  0x32   :  { %310 = vrot.lane.b32.xlu1 %v2765_v3, %s2694_s19  ;;  %308 = vrot.lane.b32.xlu0 %v2751_v1, %s2694_s19 }
  0x36   :  { %314 = vrot.lane.b32.xlu1 %v2760_v2, %s2694_s19  ;;  %312 = vrot.lane.b32.xlu0 %v2746_v0, %s2694_s19 }
  0x3a   :  { %352 = vrot.lane.b32.xlu1 %v2765_v3, %s2697_s20  ;;  %350 = vrot.lane.b32.xlu0 %v2751_v1, %s2697_s20 }
  0x3e   :  { %356 = vrot.lane.b32.xlu1 %v2760_v2, %s2697_s20  ;;  %354 = vrot.lane.b32.xlu0 %v2746_v0, %s2697_s20 }
  0x42   :  { %430 = vperm.xlu0 %2666, %v49_v6  }
  0x74   :  { %v55_v9 = vpop.permute.xlu1 %54  ;;  %v51_v10 = vpop.permute.xlu0 %50 }
  0x78   :  { %v57_v15 = vpop.permute.xlu1 %56  ;;  %v53_v16 = vpop.permute.xlu0 %52 }
  0x79   :  { %v63_v22 = vsel %vm60_vm0, %v51_v10, %v53_v16  ;;  %v64_v28 = vsel %vm60_vm0, %v57_v15, %v51_v10  ;;  %v61_v34 = vsel %vm60_vm0, %v55_v9, %v57_v15  ;;  %v62_v36 = vsel %vm60_vm0, %v53_v16, %v55_v9 }
  0x7a   :  { %v87_v32 = vmul.f32 %v2851_v20, %v63_v22  ;;  %v86_v40 = vmul.f32 %v2859_v25, %v64_v28  ;;  %v89_v43 = vmul.f32 %v2865_v27, %v61_v34  ;;  %v88_v47 = vmul.f32 %v2875_v31, %v62_v36 }
  0x7b   :  { %v2928_v9 = vrot.slane %v2437_v55, %v2843_v17  ;;  %v2931_v10 = vrot.slane %v2437_v55, %v2847_v19  ;;  %v2938_v16 = vrot.slane %v2437_v55, %v2845_v18 }
  0x7c   :  { %v97_v23 = vpop.permute.xlu1 %96  ;;  %v95_v24 = vpop.permute.xlu0 %94 }
  0x7d   :  { %v105_v29 = vsel %vm102_vm1, %v95_v24, %v97_v23 }
  0x7e   :  { %v129_v33 = vmul.f32 %v2854_v21, %v105_v29 }
  0x80   :  { %v101_v37 = vpop.permute.xlu1 %100  ;;  %v99_v38 = vpop.permute.xlu0 %98  ;;  %v2464_v39 = vpack.c.bf16 %v129_v33, %v87_v32 }
  0x81   :  { %v106_v41 = vsel %vm102_vm1, %v101_v37, %v95_v24  ;;  %v104_v42 = vsel %vm102_vm1, %v97_v23, %v99_v38  ;;  %v103_v44 = vsel %vm102_vm1, %v99_v38, %v101_v37 }
  0x82   :  { %2465 = vmatprep.subr.bf16.mxu0 %v2464_v39  ;;  %v128_v45 = vmul.f32 %v2862_v26, %v106_v41  ;;  %v131_v46 = vmul.f32 %v2872_v30, %v103_v44  ;;  %v130_v48 = vmul.f32 %v2882_v35, %v104_v42  ;;  %v2438_v41 = vld [vmem:[%s4005_s1 + $0x5] ss:$8 sm:$0xf] }
  0x84   :  { %v139_v49 = vpop.permute.xlu1 %138  ;;  %v137_v50 = vpop.permute.xlu0 %136  ;;  %v2466_v51 = vpack.c.bf16 %v128_v45, %v86_v40  ;;  %v2480_v52 = vpack.c.bf16 %v131_v46, %v89_v43  ;;  %v2482_v53 = vpack.c.bf16 %v130_v48, %v88_v47  ;;  %v2959_v47 = vrot.slane %v2438_v41, %v2843_v17 }
  0x85   :  { %v147_v60 = vsel %vm144_vm2, %v137_v50, %v139_v49  ;;  %v2962_v48 = vrot.slane %v2438_v41, %v2845_v18 }
  0x86   :  { %2467 = vmatpush1.bf16.msra.mxu0 %v2466_v51  ;;  %2481 = vmatprep.subr.bf16.mxu1 %v2480_v52  ;;  %v171_v13 = vmul.f32 %v2907_v58, %v147_v60  ;;  %v2970_v51 = vrot.slane %v2438_v41, %v2847_v19 }
  0x87   :  { %2483 = vmatpush1.bf16.msra.mxu1 %v2482_v53 }
  0x88   :  { %v143_v56 = vpop.permute.xlu1 %142  ;;  %v141_v57 = vpop.permute.xlu0 %140 }
  0x89   :  { %v148_v7 = vsel %vm144_vm2, %v143_v56, %v137_v50  ;;  %v146_v14 = vsel %vm144_vm2, %v139_v49, %v141_v57  ;;  %v145_v22 = vsel %vm144_vm2, %v141_v57, %v143_v56  ;;  %v2967_v50 = vrot.slane %v2438_v41, %v2834_v12 }
  0x8a   :  { %v170_v23 = vmul.f32 %v2915_v61, %v148_v7  ;;  %v172_v32 = vmul.f32 %v2918_v62, %v146_v14  ;;  %v173_v37 = vmul.f32 %v2921_v63, %v145_v22 }
  0x8c   :  { %v181_v5 = vpop.permute.xlu1 %180  ;;  %v179_v6 = vpop.permute.xlu0 %178 }
  0x8d   :  { %v189_v8 = vsel %vm186_vm3, %v179_v6, %v181_v5 }
  0x8e   :  { %v213_v15 = vmul.f32 %v2910_v59, %v189_v8 }
  0x90   :  { %v185_v24 = vpop.permute.xlu1 %184  ;;  %v183_v28 = vpop.permute.xlu0 %182  ;;  %v2468_v29 = vpack.c.bf16 %v213_v15, %v171_v13 }
  0x91   :  { %v190_v33 = vsel %vm186_vm3, %v185_v24, %v179_v6  ;;  %v187_v34 = vsel %vm186_vm3, %v183_v28, %v185_v24  ;;  %v188_v36 = vsel %vm186_vm3, %v181_v5, %v183_v28  ;;  %v2440_v28 = vld [vmem:[%s4005_s1 + $0x7] ss:$8 sm:$0xf] }
  0x92   :  { %v212_v38 = vmul.f32 %v2928_v9, %v190_v33  ;;  %v214_v39 = vmul.f32 %v2931_v10, %v188_v36  ;;  %v215_v40 = vmul.f32 %v2938_v16, %v187_v34  ;;  %2469 = vmatprep.subr.bf16.mxu0 %v2468_v29  ;;  %v3008_v36 = vrot.slane %v2440_v28, %v2843_v17 }
  0x94   :  { %v227_v42 = vpop.permute.xlu1 %226  ;;  %v225_v43 = vpop.permute.xlu0 %224  ;;  %v2470_v44 = vpack.c.bf16 %v212_v38, %v170_v23  ;;  %v2484_v45 = vpack.c.bf16 %v215_v40, %v173_v37  ;;  %v2486_v46 = vpack.c.bf16 %v214_v39, %v172_v32  ;;  %v3013_v38 = vrot.slane %v2440_v28, %v2845_v18 }
  0x95   :  { %v235_v49 = vsel %vm232_vm4, %v225_v43, %v227_v42  ;;  %v3016_v39 = vrot.slane %v2440_v28, %v2834_v12  ;;  %v3019_v40 = vrot.slane %v2440_v28, %v2847_v19 }
  0x96   :  { %2471 = vmatpush1.bf16.msra.mxu0 %v2470_v44  ;;  %2485 = vmatprep.subr.bf16.mxu1 %v2484_v45  ;;  %v258_v54 = vmul.f32 %v2959_v47, %v235_v49 }
  0x97   :  { %2487 = vmatpush1.bf16.msra.mxu1 %v2486_v46 }
  0x98   :  { %v231_v52 = vpop.permute.xlu1 %230  ;;  %v229_v53 = vpop.permute.xlu0 %228  ;;  %v2474_v22 = vpack.c.bf16 %v258_v54, %v2751_v1 }
  0x99   :  { %v236_v55 = vsel %vm232_vm4, %v231_v52, %v225_v43  ;;  %v233_v56 = vsel %vm232_vm4, %v229_v53, %v231_v52  ;;  %v234_v57 = vsel %vm232_vm4, %v227_v42, %v229_v53 }
  0x9a   :  { %v261_v60 = vmul.f32 %v2962_v48, %v236_v55  ;;  %v259_v5 = vmul.f32 %v2967_v50, %v234_v57  ;;  %v260_v6 = vmul.f32 %v2970_v51, %v233_v56 }
  0x9c   :  { %v269_v7 = vpop.permute.xlu1 %268  ;;  %v267_v8 = vpop.permute.xlu0 %266  ;;  %v2472_v13 = vpack.c.bf16 %v259_v5, %v2765_v3  ;;  %v2488_v14 = vpack.c.bf16 %v261_v60, %v2760_v2  ;;  %v2490_v15 = vpack.c.bf16 %v260_v6, %v2746_v0  ;;  %v2439_v2 = vld [vmem:[%s4005_s1 + $0x6] ss:$8 sm:$0xf] }
  0x9d   :  { %v2995_v0 = vrot.slane %v2439_v2, %v2845_v18  ;;  %v2998_v1 = vrot.slane %v2439_v2, %v2834_v12  ;;  %v3003_v33 = vrot.slane %v2439_v2, %v2847_v19  ;;  %v3022_v41 = vrot.slane %v2439_v2, %v2843_v17 }
  0x9e   :  { %2473 = vmatprep.subr.bf16.mxu0 %v2472_v13  ;;  %2489 = vmatprep.subr.bf16.mxu1 %v2488_v14  ;;  %v277_v43 = vsel %vm274_vm6, %v267_v8, %v269_v7 }
  0x9f   :  { %2475 = vmatpush1.bf16.msra.mxu0 %v2474_v22  ;;  %2491 = vmatpush1.bf16.msra.mxu1 %v2490_v15  ;;  %v300_v6 = vmul.f32 %v3022_v41, %v277_v43  ;;  %v2441_v22 = vld [vmem:[%s4005_s1 + $0x20] ss:$8 sm:$0xf] }
  0xa0   :  { %v273_v23 = vpop.permute.xlu1 %272  ;;  %v271_v24 = vpop.permute.xlu0 %270  ;;  %v3050_v28 = vrot.slane %v2441_v22, %v2845_v18  ;;  %v3053_v2 = vrot.slane %v2441_v22, %v2847_v19 }
  0xa1   :  { %v278_v32 = vsel %vm274_vm6, %v273_v23, %v267_v8  ;;  %v276_v34 = vsel %vm274_vm6, %v269_v7, %v271_v24  ;;  %v275_v42 = vsel %vm274_vm6, %v271_v24, %v273_v23  ;;  %v3047_v24 = vrot.slane %v2441_v22, %v2834_v12 }
  0xa2   :  { %v303_v44 = vmul.f32 %v2995_v0, %v278_v32  ;;  %v301_v45 = vmul.f32 %v2998_v1, %v276_v34  ;;  %v302_v56 = vmul.f32 %v3003_v33, %v275_v42 }
  0xa4   :  { %v311_v3 = vpop.permute.xlu1 %310  ;;  %v309_v29 = vpop.permute.xlu0 %308 }
  0xa5   :  { %v319_v37 = vsel %vm316_vm5, %v309_v29, %v311_v3 }
  0xa6   :  { %v342_v52 = vmul.f32 %v3008_v36, %v319_v37 }
  0xa8   :  { %v315_v46 = vpop.permute.xlu1 %314  ;;  %v313_v49 = vpop.permute.xlu0 %312  ;;  %v2478_v23 = vpack.c.bf16 %v342_v52, %v300_v6 }
  0xa9   :  { %v320_v53 = vsel %vm316_vm5, %v315_v46, %v309_v29  ;;  %v317_v54 = vsel %vm316_vm5, %v313_v49, %v315_v46  ;;  %v318_v55 = vsel %vm316_vm5, %v311_v3, %v313_v49  ;;  %v3056_v3 = vrot.slane %v2441_v22, %v2843_v17  ;;  %v592_v22 = vld [vmem:[%s4007_s5] sm:$0xff] }
  0xaa   :  { %v345_v57 = vmul.f32 %v3013_v38, %v320_v53  ;;  %v343_v60 = vmul.f32 %v3016_v39, %v318_v55  ;;  %v344_v5 = vmul.f32 %v3019_v40, %v317_v54 }
  0xac   :  { %v353_v7 = vpop.permute.xlu1 %352  ;;  %v351_v8 = vpop.permute.xlu0 %350  ;;  %v2476_v13 = vpack.c.bf16 %v343_v60, %v301_v45  ;;  %v2492_v14 = vpack.c.bf16 %v345_v57, %v303_v44  ;;  %v2494_v15 = vpack.c.bf16 %v344_v5, %v302_v56  ;;  %v48_v44 = vld [vmem:[%s4006_s2] sm:$0xff] }
  0xad   :  { %v361_v29 = vsel %vm358_vm7, %v351_v8, %v353_v7 }
  0xae   :  { %2477 = vmatprep.subr.bf16.mxu0 %v2476_v13  ;;  %2493 = vmatprep.subr.bf16.mxu1 %v2492_v14  ;;  %v384_v43 = vmul.f32 %v3056_v3, %v361_v29 }
  0xaf   :  { %2479 = vmatpush1.bf16.msra.mxu0 %v2478_v23  ;;  %2495 = vmatpush1.bf16.msra.mxu1 %v2494_v15 }
  0xb0   :  { %v357_v32 = vpop.permute.xlu1 %356  ;;  %v355_v34 = vpop.permute.xlu0 %354 }
  0xb1   :  { %v362_v12 = vsel %vm358_vm7, %v357_v32, %v351_v8  ;;  %v359_v18 = vsel %vm358_vm7, %v355_v34, %v357_v32  ;;  %v360_v19 = vsel %vm358_vm7, %v353_v7, %v355_v34 }
  0xb2   :  { %v385_v37 = vmul.f32 %v3047_v24, %v360_v19  ;;  %v387_v42 = vmul.f32 %v3050_v28, %v362_v12  ;;  %v386_v17 = vmul.f32 %v3053_v2, %v359_v18 }
  0xb4   :  { %453 = vmatprep.subr.mxu0 %v385_v37  ;;  %524 = vmatprep.subr.mxu1 %v387_v42 }
  0xb5   :  { %454 = vmatpush1.msra.mxu0 %v384_v43  ;;  %525 = vmatpush1.msra.mxu1 %v386_v17 }
  0xb6   :  { %2442 = vmatmul.mubr.msk.f32.vlgmr.msra.gmra.mrb[0].mxu0 %vm433_vm8, %v48_v44  ;;  %2443 = vmatmul.mubr.msk.f32.vlgmr.msra.gmra.mrb[0].mxu1 %vm433_vm8, %v48_v44 }
  0xb7   :  { %865 = vmatprep.mubr.f32.mxu0 %v2695_v4  ;;  %936 = vmatprep.mubr.f32.mxu1 %v2695_v4 }
  0xc1   :  { %v431_v45 = vpop.permute.xlu0 %430 }
 0x189   :  { %v503_v46 = vpop.f32.mrb[0].mxu0  ;;  %v574_v49 = vpop.f32.mrb[0].mxu1 }
 0x18a   :  { %v504_v52 = vadd.f32 %v503_v46, %v431_v45  ;;  %v575_v53 = vadd.f32 %v574_v49, %v431_v45  ;;  %v505_v54 = vpop.f32.mrb[1].mxu0  ;;  %v576_v55 = vpop.f32.mrb[1].mxu1 }
 0x18b   :  { %v506_v56 = vadd.f32 %v505_v54, %v431_v45  ;;  %v577_v8 = vadd.f32 %v576_v55, %v431_v45 }
 0x18c   :  { %vm579_vm9 = vcmp.ge.f32.partialorder %v504_v52, 0.0  ;;  %vm581_vm10 = vcmp.ge.f32.partialorder %v575_v53, 0.0  ;;  %v583_v57 = vmul.f32 0.1, %v504_v52  ;;  %v585_v60 = vmul.f32 0.1, %v575_v53 }
 0x18d   :  { %v584_v7 = vmul.f32 0.1, %v506_v56  ;;  %vm580_vm11 = vcmp.ge.f32.partialorder %v506_v56, 0.0  ;;  %v586_v14 = vmul.f32 0.1, %v577_v8  ;;  %vm582_vm12 = vcmp.ge.f32.partialorder %v577_v8, 0.0 }
 0x18e   :  { %v3077_v5 = vsel %vm579_vm9, %v504_v52, %v583_v57  ;;  %v3079_v6 = vsel %vm581_vm10, %v575_v53, %v585_v60 }
 0x18f   :  { %597 = vrot.lane.b32.xlu0 %v3079_v6, %s2688_s9  ;;  %593 = vrot.lane.b32.xlu1 %v3077_v5, %s2688_s9  ;;  %v3085_v13 = vsel %vm580_vm11, %v506_v56, %v584_v7  ;;  %v3091_v15 = vsel %vm582_vm12, %v577_v8, %v586_v14 }
 0x193   :  { %613 = vrot.lane.b32.xlu0 %v3077_v5, %s2689_s14  ;;  %595 = vrot.lane.b32.xlu1 %v3085_v13, %s2688_s9 }
 0x197   :  { %617 = vrot.lane.b32.xlu0 %v3079_v6, %s2689_s14  ;;  %599 = vrot.lane.b32.xlu1 %v3091_v15, %s2688_s9 }
 0x19b   :  { %633 = vrot.lane.b32.xlu0 %v3077_v5, %s2690_s15  ;;  %615 = vrot.lane.b32.xlu1 %v3085_v13, %s2689_s14 }
 0x19f   :  { %637 = vrot.lane.b32.xlu0 %v3079_v6, %s2690_s15  ;;  %619 = vrot.lane.b32.xlu1 %v3091_v15, %s2689_s14 }
 0x1a3   :  { %653 = vrot.lane.b32.xlu0 %v3077_v5, %s2691_s16  ;;  %635 = vrot.lane.b32.xlu1 %v3085_v13, %s2690_s15 }
 0x1a7   :  { %657 = vrot.lane.b32.xlu0 %v3079_v6, %s2691_s16  ;;  %639 = vrot.lane.b32.xlu1 %v3091_v15, %s2690_s15 }
 0x1ab   :  { %677 = vrot.lane.b32.xlu0 %v3077_v5, %s2692_s17  ;;  %655 = vrot.lane.b32.xlu1 %v3085_v13, %s2691_s16 }
 0x1af   :  { %681 = vrot.lane.b32.xlu0 %v3079_v6, %s2692_s17  ;;  %659 = vrot.lane.b32.xlu1 %v3091_v15, %s2691_s16 }
 0x1b3   :  { %697 = vrot.lane.b32.xlu0 %v3077_v5, %s2693_s18  ;;  %679 = vrot.lane.b32.xlu1 %v3085_v13, %s2692_s17 }
 0x1b7   :  { %701 = vrot.lane.b32.xlu0 %v3079_v6, %s2693_s18  ;;  %683 = vrot.lane.b32.xlu1 %v3091_v15, %s2692_s17 }
 0x1bb   :  { %717 = vrot.lane.b32.xlu0 %v3077_v5, %s2694_s19  ;;  %699 = vrot.lane.b32.xlu1 %v3085_v13, %s2693_s18 }
 0x1bf   :  { %721 = vrot.lane.b32.xlu0 %v3079_v6, %s2694_s19  ;;  %703 = vrot.lane.b32.xlu1 %v3091_v15, %s2693_s18 }
 0x1c3   :  { %737 = vrot.lane.b32.xlu0 %v3077_v5, %s2697_s20  ;;  %719 = vrot.lane.b32.xlu1 %v3085_v13, %s2694_s19 }
 0x1c7   :  { %741 = vrot.lane.b32.xlu0 %v3079_v6, %s2697_s20  ;;  %723 = vrot.lane.b32.xlu1 %v3091_v15, %s2694_s19 }
 0x1cb   :  { %795 = vperm.xlu0 %2666, %v592_v22   ;;  %739 = vrot.lane.b32.xlu1 %v3085_v13, %s2697_s20 }
 0x1cf   :  { %743 = vrot.lane.b32.xlu1 %v3091_v15, %s2697_s20 }
 0x201   :  { %v598_v23 = vpop.permute.xlu0 %597  ;;  %v594_v29 = vpop.permute.xlu1 %593 }
 0x205   :  { %v614_v32 = vpop.permute.xlu0 %613  ;;  %v596_v34 = vpop.permute.xlu1 %595 }
 0x206   :  { %v603_v19 = vsel %vm60_vm0, %v594_v29, %v596_v34  ;;  %v602_v52 = vsel %vm60_vm0, %v596_v34, %v598_v23 }
 0x207   :  { %v606_v43 = vmul.f32 %v603_v19, %v2851_v20 }
 0x209   :  { %v618_v12 = vpop.permute.xlu0 %617  ;;  %v600_v18 = vpop.permute.xlu1 %599 }
 0x20a   :  { %v601_v46 = vsel %vm60_vm0, %v598_v23, %v600_v18  ;;  %v604_v49 = vsel %vm60_vm0, %v600_v18, %v594_v29  ;;  %v607_v23 = vmul.f32 %v602_v52, %v2875_v31 }
 0x20b   :  { %v605_v7 = vmul.f32 %v604_v49, %v2859_v25  ;;  %v608_v8 = vmul.f32 %v601_v46, %v2865_v27 }
 0x20d   :  { %v634_v37 = vpop.permute.xlu0 %633  ;;  %v616_v42 = vpop.permute.xlu1 %615 }
 0x20e   :  { %v623_v17 = vsel %vm102_vm1, %v614_v32, %v616_v42  ;;  %v622_v44 = vsel %vm102_vm1, %v616_v42, %v618_v12 }
 0x20f   :  { %v626_v45 = vmul.f32 %v623_v17, %v2854_v21  ;;  %v627_v56 = vmul.f32 %v622_v44, %v2882_v35 }
 0x211   :  { %v638_v53 = vpop.permute.xlu0 %637  ;;  %v620_v54 = vpop.permute.xlu1 %619  ;;  %v2496_v55 = vpack.c.bf16 %v626_v45, %v606_v43  ;;  %v2514_v42 = vpack.c.bf16 %v627_v56, %v607_v23 }
 0x212   :  { %v621_v57 = vsel %vm102_vm1, %v618_v12, %v620_v54  ;;  %v624_v60 = vsel %vm102_vm1, %v620_v54, %v614_v32 }
 0x213   :  { %v625_v14 = vmul.f32 %v624_v60, %v2862_v26  ;;  %v628_v22 = vmul.f32 %v621_v57, %v2872_v30  ;;  %2497 = vmatprep.subr.bf16.mxu0 %v2496_v55 }
 0x215   :  { %v2498_v29 = vpack.c.bf16 %v625_v14, %v605_v7  ;;  %v654_v34 = vpop.permute.xlu0 %653  ;;  %v636_v18 = vpop.permute.xlu1 %635  ;;  %v2512_v19 = vpack.c.bf16 %v628_v22, %v608_v8 }
 0x216   :  { %v643_v17 = vsel %vm144_vm2, %v634_v37, %v636_v18  ;;  %v642_v56 = vsel %vm144_vm2, %v636_v18, %v638_v53 }
 0x217   :  { %2499 = vmatpush1.bf16.msra.mxu0 %v2498_v29  ;;  %2513 = vmatprep.subr.bf16.mxu1 %v2512_v19  ;;  %v646_v46 = vmul.f32 %v643_v17, %v2907_v58 }
 0x218   :  { %2515 = vmatpush1.bf16.msra.mxu1 %v2514_v42 }
 0x219   :  { %v658_v32 = vpop.permute.xlu0 %657  ;;  %v640_v12 = vpop.permute.xlu1 %639 }
 0x21a   :  { %v641_v54 = vsel %vm144_vm2, %v638_v53, %v640_v12  ;;  %v644_v55 = vsel %vm144_vm2, %v640_v12, %v634_v37  ;;  %v647_v53 = vmul.f32 %v642_v56, %v2918_v62 }
 0x21b   :  { %v645_v23 = vmul.f32 %v644_v55, %v2915_v61  ;;  %v648_v29 = vmul.f32 %v641_v54, %v2921_v63 }
 0x21d   :  { %v678_v43 = vpop.permute.xlu0 %677  ;;  %v656_v44 = vpop.permute.xlu1 %655 }
 0x21e   :  { %v663_v45 = vsel %vm186_vm3, %v654_v34, %v656_v44  ;;  %v662_v49 = vsel %vm186_vm3, %v656_v44, %v658_v32 }
 0x21f   :  { %v666_v52 = vmul.f32 %v663_v45, %v2910_v59  ;;  %v667_v8 = vmul.f32 %v662_v49, %v2931_v10 }
 0x221   :  { %v682_v57 = vpop.permute.xlu0 %681  ;;  %v660_v60 = vpop.permute.xlu1 %659  ;;  %v2500_v7 = vpack.c.bf16 %v666_v52, %v646_v46  ;;  %v2518_v44 = vpack.c.bf16 %v667_v8, %v647_v53 }
 0x222   :  { %v661_v14 = vsel %vm186_vm3, %v658_v32, %v660_v60  ;;  %v664_v22 = vsel %vm186_vm3, %v660_v60, %v654_v34 }
 0x223   :  { %v665_v37 = vmul.f32 %v664_v22, %v2928_v9  ;;  %v668_v19 = vmul.f32 %v661_v14, %v2938_v16  ;;  %2501 = vmatprep.subr.bf16.mxu0 %v2500_v7 }
 0x225   :  { %v2502_v18 = vpack.c.bf16 %v665_v37, %v645_v23  ;;  %v698_v42 = vpop.permute.xlu0 %697  ;;  %v680_v12 = vpop.permute.xlu1 %679  ;;  %v2516_v17 = vpack.c.bf16 %v668_v19, %v648_v29 }
 0x226   :  { %v686_v32 = vsel %vm232_vm4, %v680_v12, %v682_v57  ;;  %v687_v34 = vsel %vm232_vm4, %v678_v43, %v680_v12 }
 0x227   :  { %v689_v45 = vmul.f32 %v687_v34, %v2959_v47  ;;  %v690_v46 = vmul.f32 %v686_v32, %v2967_v50  ;;  %2503 = vmatpush1.bf16.msra.mxu0 %v2502_v18  ;;  %2517 = vmatprep.subr.bf16.mxu1 %v2516_v17 }
 0x228   :  { %2519 = vmatpush1.bf16.msra.mxu1 %v2518_v44 }
 0x229   :  { %v2506_v49 = vpack.c.bf16 %v689_v45, %v3077_v5  ;;  %v702_v52 = vpop.permute.xlu0 %701  ;;  %v684_v54 = vpop.permute.xlu1 %683  ;;  %v2504_v55 = vpack.c.bf16 %v690_v46, %v3085_v13 }
 0x22a   :  { %v685_v56 = vsel %vm232_vm4, %v682_v57, %v684_v54  ;;  %v688_v60 = vsel %vm232_vm4, %v684_v54, %v678_v43 }
 0x22b   :  { %v691_v7 = vmul.f32 %v685_v56, %v2970_v51  ;;  %v692_v8 = vmul.f32 %v688_v60, %v2962_v48  ;;  %2505 = vmatprep.subr.bf16.mxu0 %v2504_v55 }
 0x22c   :  { %2507 = vmatpush1.bf16.msra.mxu0 %v2506_v49 }
 0x22d   :  { %v2522_v14 = vpack.c.bf16 %v691_v7, %v3079_v6  ;;  %v718_v22 = vpop.permute.xlu0 %717  ;;  %v700_v5 = vpop.permute.xlu1 %699  ;;  %v2520_v23 = vpack.c.bf16 %v692_v8, %v3091_v15 }
 0x22e   :  { %v706_v57 = vsel %vm274_vm6, %v700_v5, %v702_v52  ;;  %v707_v43 = vsel %vm274_vm6, %v698_v42, %v700_v5 }
 0x22f   :  { %2521 = vmatprep.subr.bf16.mxu1 %v2520_v23  ;;  %v709_v53 = vmul.f32 %v707_v43, %v3022_v41  ;;  %v710_v15 = vmul.f32 %v706_v57, %v2998_v1 }
 0x230   :  { %2523 = vmatpush1.bf16.msra.mxu1 %v2522_v14 }
 0x231   :  { %v722_v13 = vpop.permute.xlu0 %721  ;;  %v704_v29 = vpop.permute.xlu1 %703 }
 0x232   :  { %v705_v44 = vsel %vm274_vm6, %v702_v52, %v704_v29  ;;  %v708_v32 = vsel %vm274_vm6, %v704_v29, %v698_v42  ;;  %v591_v29 = vld [vmem:[%s4008_s4] sm:$0xff] }
 0x233   :  { %v711_v55 = vmul.f32 %v705_v44, %v3003_v33  ;;  %v712_v56 = vmul.f32 %v708_v32, %v2995_v0 }
 0x235   :  { %v720_v37 = vpop.permute.xlu1 %719  ;;  %v738_v18 = vpop.permute.xlu0 %737 }
 0x236   :  { %v726_v19 = vsel %vm316_vm5, %v720_v37, %v722_v13  ;;  %v727_v6 = vsel %vm316_vm5, %v718_v22, %v720_v37 }
 0x237   :  { %v729_v12 = vmul.f32 %v727_v6, %v3008_v36  ;;  %v730_v17 = vmul.f32 %v726_v19, %v3016_v39 }
 0x239   :  { %v2510_v34 = vpack.c.bf16 %v729_v12, %v709_v53  ;;  %v724_v45 = vpop.permute.xlu1 %723  ;;  %v2508_v46 = vpack.c.bf16 %v730_v17, %v710_v15  ;;  %v742_v42 = vpop.permute.xlu0 %741 }
 0x23a   :  { %v725_v49 = vsel %vm316_vm5, %v722_v13, %v724_v45  ;;  %v728_v54 = vsel %vm316_vm5, %v724_v45, %v718_v22 }
 0x23b   :  { %v731_v60 = vmul.f32 %v725_v49, %v3019_v40  ;;  %v732_v52 = vmul.f32 %v728_v54, %v3013_v38  ;;  %2509 = vmatprep.subr.bf16.mxu0 %v2508_v46 }
 0x23c   :  { %2511 = vmatpush1.bf16.msra.mxu0 %v2510_v34 }
 0x23d   :  { %v2526_v7 = vpack.c.bf16 %v731_v60, %v711_v55  ;;  %v740_v8 = vpop.permute.xlu1 %739  ;;  %v2524_v14 = vpack.c.bf16 %v732_v52, %v712_v56 }
 0x23e   :  { %v746_v5 = vsel %vm358_vm7, %v740_v8, %v742_v42  ;;  %v747_v22 = vsel %vm358_vm7, %v738_v18, %v740_v8 }
 0x23f   :  { %v749_v23 = vmul.f32 %v747_v22, %v3056_v3  ;;  %2525 = vmatprep.subr.bf16.mxu1 %v2524_v14  ;;  %v750_v13 = vmul.f32 %v746_v5, %v3047_v24 }
 0x240   :  { %2527 = vmatpush1.bf16.msra.mxu1 %v2526_v7  ;;  %v2447_v7 = vld [vmem:[%s4007_s5 + $0x8] sm:$0xff] }
 0x241   :  { %817 = vmatprep.subr.mxu0 %v750_v13  ;;  %v744_v57 = vpop.permute.xlu1 %743 }
 0x242   :  { %v745_v43 = vsel %vm358_vm7, %v742_v42, %v744_v57  ;;  %v748_v37 = vsel %vm358_vm7, %v744_v57, %v738_v18  ;;  %818 = vmatpush1.msra.mxu0 %v749_v23 }
 0x243   :  { %v751_v19 = vmul.f32 %v745_v43, %v3053_v2  ;;  %2444 = vmatmul.mubr.msk.f32.vlgmr.msra.gmra.mrb[2].mxu0 %vm433_vm8, %v591_v29  ;;  %v752_v6 = vmul.f32 %v748_v37, %v3050_v28 }
 0x244   :  { %1231 = vmatprep.mubr.f32.mxu0 %v2695_v4 }
 0x245   :  { %888 = vmatprep.subr.mxu1 %v752_v6 }
 0x246   :  { %889 = vmatpush1.msra.mxu1 %v751_v19 }
 0x247   :  { %2445 = vmatmul.mubr.msk.f32.vlgmr.msra.gmra.mrb[2].mxu1 %vm433_vm8, %v591_v29 }
 0x248   :  { %1302 = vmatprep.mubr.f32.mxu1 %v2695_v4 }
 0x24a   :  { %v796_v53 = vpop.permute.xlu0 %795 }
 0x316   :  { %v867_v15 = vpop.f32.mrb[2].mxu0 }
 0x317   :  { %v868_v12 = vadd.f32 %v867_v15, %v796_v53  ;;  %v869_v17 = vpop.f32.mrb[3].mxu0 }
 0x318   :  { %v870_v18 = vadd.f32 %v869_v17, %v796_v53 }
 0x319   :  { %vm943_vm13 = vcmp.ge.f32.partialorder %v868_v12, 0.0  ;;  %v947_v44 = vmul.f32 0.1, %v868_v12 }
 0x31a   :  { %vm944_vm14 = vcmp.ge.f32.partialorder %v870_v18, 0.0  ;;  %v948_v32 = vmul.f32 0.1, %v870_v18  ;;  %v938_v34 = vpop.f32.mrb[2].mxu1 }
 0x31b   :  { %v3259_v45 = vsel %vm943_vm13, %v868_v12, %v947_v44  ;;  %v939_v46 = vadd.f32 %v938_v34, %v796_v53  ;;  %v940_v49 = vpop.f32.mrb[3].mxu1 }
 0x31c   :  { %v3261_v54 = vsel %vm944_vm14, %v870_v18, %v948_v32  ;;  %v941_v55 = vadd.f32 %v940_v49, %v796_v53  ;;  %959 = vrot.lane.b32.xlu1 %v3259_v45, %s2688_s9 }
 0x31d   :  { %vm945_vm15 = vcmp.ge.f32.partialorder %v939_v46, 0.0  ;;  %v949_v56 = vmul.f32 0.1, %v939_v46  ;;  %961 = vrot.lane.b32.xlu0 %v3261_v54, %s2688_s9 }
 0x31e   :  { %vm946_vm9 = vcmp.ge.f32.partialorder %v941_v55, 0.0  ;;  %v950_v60 = vmul.f32 0.1, %v941_v55 }
 0x31f   :  { %v3267_v52 = vsel %vm945_vm15, %v939_v46, %v949_v56 }
 0x320   :  { %v3269_v42 = vsel %vm946_vm9, %v941_v55, %v950_v60  ;;  %963 = vrot.lane.b32.xlu1 %v3267_v52, %s2688_s9 }
 0x321   :  { %965 = vrot.lane.b32.xlu0 %v3269_v42, %s2688_s9 }
 0x324   :  { %979 = vrot.lane.b32.xlu1 %v3259_v45, %s2689_s14 }
 0x325   :  { %981 = vrot.lane.b32.xlu0 %v3261_v54, %s2689_s14 }
 0x328   :  { %983 = vrot.lane.b32.xlu1 %v3267_v52, %s2689_s14 }
 0x329   :  { %985 = vrot.lane.b32.xlu0 %v3269_v42, %s2689_s14 }
 0x32c   :  { %999 = vrot.lane.b32.xlu1 %v3259_v45, %s2690_s15 }
 0x32d   :  { %1001 = vrot.lane.b32.xlu0 %v3261_v54, %s2690_s15 }
 0x330   :  { %1003 = vrot.lane.b32.xlu1 %v3267_v52, %s2690_s15 }
 0x331   :  { %1005 = vrot.lane.b32.xlu0 %v3269_v42, %s2690_s15 }
 0x334   :  { %1019 = vrot.lane.b32.xlu1 %v3259_v45, %s2691_s16 }
 0x335   :  { %1021 = vrot.lane.b32.xlu0 %v3261_v54, %s2691_s16 }
 0x338   :  { %1023 = vrot.lane.b32.xlu1 %v3267_v52, %s2691_s16 }
 0x339   :  { %1025 = vrot.lane.b32.xlu0 %v3269_v42, %s2691_s16 }
 0x33c   :  { %1043 = vrot.lane.b32.xlu1 %v3259_v45, %s2692_s17 }
 0x33d   :  { %1045 = vrot.lane.b32.xlu0 %v3261_v54, %s2692_s17 }
 0x340   :  { %1047 = vrot.lane.b32.xlu1 %v3267_v52, %s2692_s17 }
 0x341   :  { %1049 = vrot.lane.b32.xlu0 %v3269_v42, %s2692_s17 }
 0x344   :  { %1063 = vrot.lane.b32.xlu1 %v3259_v45, %s2693_s18 }
 0x345   :  { %1065 = vrot.lane.b32.xlu0 %v3261_v54, %s2693_s18 }
 0x348   :  { %1067 = vrot.lane.b32.xlu1 %v3267_v52, %s2693_s18 }
 0x349   :  { %1069 = vrot.lane.b32.xlu0 %v3269_v42, %s2693_s18 }
 0x34c   :  { %1083 = vrot.lane.b32.xlu1 %v3259_v45, %s2694_s19 }
 0x34d   :  { %1085 = vrot.lane.b32.xlu0 %v3261_v54, %s2694_s19 }
 0x350   :  { %1087 = vrot.lane.b32.xlu1 %v3267_v52, %s2694_s19 }
 0x351   :  { %1089 = vrot.lane.b32.xlu0 %v3269_v42, %s2694_s19 }
 0x354   :  { %1103 = vrot.lane.b32.xlu1 %v3259_v45, %s2697_s20 }
 0x355   :  { %1105 = vrot.lane.b32.xlu0 %v3261_v54, %s2697_s20 }
 0x358   :  { %1107 = vrot.lane.b32.xlu1 %v3267_v52, %s2697_s20 }
 0x359   :  { %1109 = vrot.lane.b32.xlu0 %v3269_v42, %s2697_s20 }
 0x35c   :  { %1161 = vperm.xlu1 %2667, %v2447_v7  }
 0x38e   :  { %v960_v8 = vpop.permute.xlu1 %959 }
 0x38f   :  { %v962_v14 = vpop.permute.xlu0 %961 }
 0x390   :  { %v969_v23 = vsel %vm60_vm0, %v960_v8, %v962_v14 }
 0x391   :  { %v972_v43 = vmul.f32 %v969_v23, %v2851_v20 }
 0x392   :  { %v964_v5 = vpop.permute.xlu1 %963 }
 0x393   :  { %v966_v22 = vpop.permute.xlu0 %965  ;;  %v968_v15 = vsel %vm60_vm0, %v962_v14, %v964_v5 }
 0x394   :  { %v967_v19 = vsel %vm60_vm0, %v964_v5, %v966_v22  ;;  %v970_v6 = vsel %vm60_vm0, %v966_v22, %v960_v8  ;;  %v973_v60 = vmul.f32 %v968_v15, %v2875_v31 }
 0x395   :  { %v971_v46 = vmul.f32 %v970_v6, %v2859_v25  ;;  %v974_v49 = vmul.f32 %v967_v19, %v2865_v27 }
 0x396   :  { %v980_v13 = vpop.permute.xlu1 %979 }
 0x397   :  { %v982_v29 = vpop.permute.xlu0 %981 }
 0x398   :  { %v989_v57 = vsel %vm102_vm1, %v980_v13, %v982_v29 }
 0x399   :  { %v992_v37 = vmul.f32 %v989_v57, %v2854_v21 }
 0x39a   :  { %v984_v53 = vpop.permute.xlu1 %983 }
 0x39b   :  { %v988_v12 = vsel %vm102_vm1, %v982_v29, %v984_v53  ;;  %v986_v17 = vpop.permute.xlu0 %985  ;;  %v2528_v18 = vpack.c.bf16 %v992_v37, %v972_v43 }
 0x39c   :  { %v993_v44 = vmul.f32 %v988_v12, %v2882_v35  ;;  %v987_v32 = vsel %vm102_vm1, %v984_v53, %v986_v17  ;;  %v990_v34 = vsel %vm102_vm1, %v986_v17, %v980_v13 }
 0x39d   :  { %v991_v55 = vmul.f32 %v990_v34, %v2862_v26  ;;  %v994_v56 = vmul.f32 %v987_v32, %v2872_v30  ;;  %2529 = vmatprep.subr.bf16.mxu0 %v2528_v18 }
 0x39e   :  { %v1000_v7 = vpop.permute.xlu1 %999  ;;  %v2546_v22 = vpack.c.bf16 %v993_v44, %v973_v60 }
 0x39f   :  { %v2530_v8 = vpack.c.bf16 %v991_v55, %v971_v46  ;;  %v1002_v14 = vpop.permute.xlu0 %1001  ;;  %v2544_v5 = vpack.c.bf16 %v994_v56, %v974_v49 }
 0x3a0   :  { %v1009_v29 = vsel %vm144_vm2, %v1000_v7, %v1002_v14 }
 0x3a1   :  { %2531 = vmatpush1.bf16.msra.mxu0 %v2530_v8  ;;  %2545 = vmatprep.subr.bf16.mxu1 %v2544_v5  ;;  %v1012_v19 = vmul.f32 %v1009_v29, %v2907_v58 }
 0x3a2   :  { %2547 = vmatpush1.bf16.msra.mxu1 %v2546_v22  ;;  %v1004_v23 = vpop.permute.xlu1 %1003 }
 0x3a3   :  { %v1006_v13 = vpop.permute.xlu0 %1005  ;;  %v1008_v17 = vsel %vm144_vm2, %v1002_v14, %v1004_v23 }
 0x3a4   :  { %v1007_v53 = vsel %vm144_vm2, %v1004_v23, %v1006_v13  ;;  %v1010_v15 = vsel %vm144_vm2, %v1006_v13, %v1000_v7  ;;  %v1013_v8 = vmul.f32 %v1008_v17, %v2918_v62 }
 0x3a5   :  { %v1011_v55 = vmul.f32 %v1010_v15, %v2915_v61  ;;  %v1014_v56 = vmul.f32 %v1007_v53, %v2921_v63 }
 0x3a6   :  { %v1020_v57 = vpop.permute.xlu1 %1019 }
 0x3a7   :  { %v1022_v43 = vpop.permute.xlu0 %1021 }
 0x3a8   :  { %v1029_v37 = vsel %vm186_vm3, %v1020_v57, %v1022_v43 }
 0x3a9   :  { %v1032_v6 = vmul.f32 %v1029_v37, %v2910_v59 }
 0x3aa   :  { %v1024_v12 = vpop.permute.xlu1 %1023 }
 0x3ab   :  { %v1028_v18 = vsel %vm186_vm3, %v1022_v43, %v1024_v12  ;;  %v1026_v44 = vpop.permute.xlu0 %1025  ;;  %v2532_v32 = vpack.c.bf16 %v1032_v6, %v1012_v19 }
 0x3ac   :  { %v1033_v34 = vmul.f32 %v1028_v18, %v2931_v10  ;;  %v1027_v46 = vsel %vm186_vm3, %v1024_v12, %v1026_v44  ;;  %v1030_v49 = vsel %vm186_vm3, %v1026_v44, %v1020_v57 }
 0x3ad   :  { %v1031_v60 = vmul.f32 %v1030_v49, %v2928_v9  ;;  %v1034_v7 = vmul.f32 %v1027_v46, %v2938_v16  ;;  %2533 = vmatprep.subr.bf16.mxu0 %v2532_v32 }
 0x3ae   :  { %v1044_v14 = vpop.permute.xlu1 %1043  ;;  %v2550_v13 = vpack.c.bf16 %v1033_v34, %v1013_v8 }
 0x3af   :  { %v2534_v5 = vpack.c.bf16 %v1031_v60, %v1011_v55  ;;  %v1046_v22 = vpop.permute.xlu0 %1045  ;;  %v2548_v23 = vpack.c.bf16 %v1034_v7, %v1014_v56 }
 0x3b0   :  { %v1053_v29 = vsel %vm232_vm4, %v1044_v14, %v1046_v22 }
 0x3b1   :  { %2535 = vmatpush1.bf16.msra.mxu0 %v2534_v5  ;;  %2549 = vmatprep.subr.bf16.mxu1 %v2548_v23  ;;  %v1055_v43 = vmul.f32 %v1053_v29, %v2959_v47 }
 0x3b2   :  { %2551 = vmatpush1.bf16.msra.mxu1 %v2550_v13  ;;  %v1048_v57 = vpop.permute.xlu1 %1047 }
 0x3b3   :  { %v1052_v37 = vsel %vm232_vm4, %v1046_v22, %v1048_v57  ;;  %v1050_v19 = vpop.permute.xlu0 %1049  ;;  %v2538_v32 = vpack.c.bf16 %v1055_v43, %v3259_v45 }
 0x3b4   :  { %v1056_v6 = vmul.f32 %v1052_v37, %v2967_v50  ;;  %v1051_v53 = vsel %vm232_vm4, %v1048_v57, %v1050_v19  ;;  %v1054_v15 = vsel %vm232_vm4, %v1050_v19, %v1044_v14 }
 0x3b5   :  { %v1057_v12 = vmul.f32 %v1051_v53, %v2970_v51  ;;  %v1058_v17 = vmul.f32 %v1054_v15, %v2962_v48 }
 0x3b6   :  { %v1064_v18 = vpop.permute.xlu1 %1063  ;;  %v2536_v44 = vpack.c.bf16 %v1056_v6, %v3261_v54 }
 0x3b7   :  { %v2554_v34 = vpack.c.bf16 %v1057_v12, %v3267_v52  ;;  %v1066_v46 = vpop.permute.xlu0 %1065  ;;  %v2552_v49 = vpack.c.bf16 %v1058_v17, %v3269_v42 }
 0x3b8   :  { %2537 = vmatprep.subr.bf16.mxu0 %v2536_v44  ;;  %v1073_v8 = vsel %vm274_vm6, %v1064_v18, %v1066_v46 }
 0x3b9   :  { %2539 = vmatpush1.bf16.msra.mxu0 %v2538_v32  ;;  %2553 = vmatprep.subr.bf16.mxu1 %v2552_v49  ;;  %v1075_v5 = vmul.f32 %v1073_v8, %v3022_v41 }
 0x3ba   :  { %2555 = vmatpush1.bf16.msra.mxu1 %v2554_v34  ;;  %v1068_v55 = vpop.permute.xlu1 %1067 }
 0x3bb   :  { %v1070_v56 = vpop.permute.xlu0 %1069  ;;  %v1072_v45 = vsel %vm274_vm6, %v1066_v46, %v1068_v55 }
 0x3bc   :  { %v1071_v52 = vsel %vm274_vm6, %v1068_v55, %v1070_v56  ;;  %v1074_v42 = vsel %vm274_vm6, %v1070_v56, %v1064_v18  ;;  %v1076_v29 = vmul.f32 %v1072_v45, %v2998_v1 }
 0x3bd   :  { %v1077_v19 = vmul.f32 %v1071_v52, %v3003_v33  ;;  %v1078_v6 = vmul.f32 %v1074_v42, %v2995_v0  ;;  %v2446_v42 = vld [vmem:[%s4008_s4 + $0x8] sm:$0xff] }
 0x3be   :  { %v1084_v60 = vpop.permute.xlu1 %1083 }
 0x3bf   :  { %v1086_v7 = vpop.permute.xlu0 %1085 }
 0x3c0   :  { %v1093_v54 = vsel %vm316_vm5, %v1084_v60, %v1086_v7 }
 0x3c1   :  { %v1095_v22 = vmul.f32 %v1093_v54, %v3008_v36 }
 0x3c2   :  { %v1088_v14 = vpop.permute.xlu1 %1087 }
 0x3c3   :  { %v1092_v23 = vsel %vm316_vm5, %v1086_v7, %v1088_v14  ;;  %v1090_v13 = vpop.permute.xlu0 %1089  ;;  %v2542_v18 = vpack.c.bf16 %v1095_v22, %v1075_v5 }
 0x3c4   :  { %v1096_v57 = vmul.f32 %v1092_v23, %v3016_v39  ;;  %v1091_v43 = vsel %vm316_vm5, %v1088_v14, %v1090_v13  ;;  %v1094_v37 = vsel %vm316_vm5, %v1090_v13, %v1084_v60 }
 0x3c5   :  { %v1097_v53 = vmul.f32 %v1091_v43, %v3019_v40  ;;  %v1098_v15 = vmul.f32 %v1094_v37, %v3013_v38 }
 0x3c6   :  { %v1104_v12 = vpop.permute.xlu1 %1103  ;;  %v2540_v17 = vpack.c.bf16 %v1096_v57, %v1076_v29 }
 0x3c7   :  { %v2558_v44 = vpack.c.bf16 %v1097_v53, %v1077_v19  ;;  %v1106_v32 = vpop.permute.xlu0 %1105  ;;  %v2556_v34 = vpack.c.bf16 %v1098_v15, %v1078_v6  ;;  %v2451_v19 = vld [vmem:[%s4007_s5 + $0x10] sm:$0xff] }
 0x3c8   :  { %2541 = vmatprep.subr.bf16.mxu0 %v2540_v17  ;;  %v1113_v46 = vsel %vm358_vm7, %v1104_v12, %v1106_v32 }
 0x3c9   :  { %2543 = vmatpush1.bf16.msra.mxu0 %v2542_v18  ;;  %2557 = vmatprep.subr.bf16.mxu1 %v2556_v34  ;;  %v1115_v54 = vmul.f32 %v1113_v46, %v3056_v3 }
 0x3ca   :  { %2559 = vmatpush1.bf16.msra.mxu1 %v2558_v44  ;;  %v1108_v49 = vpop.permute.xlu1 %1107 }
 0x3cb   :  { %v1112_v55 = vsel %vm358_vm7, %v1106_v32, %v1108_v49  ;;  %v1110_v56 = vpop.permute.xlu0 %1109 }
 0x3cc   :  { %v1111_v60 = vsel %vm358_vm7, %v1108_v49, %v1110_v56  ;;  %v1114_v7 = vsel %vm358_vm7, %v1110_v56, %v1104_v12  ;;  %v1116_v8 = vmul.f32 %v1112_v55, %v3047_v24 }
 0x3cd   :  { %v1117_v45 = vmul.f32 %v1111_v60, %v3053_v2  ;;  %v1118_v52 = vmul.f32 %v1114_v7, %v3050_v28 }
 0x3ce   :  { %1183 = vmatprep.subr.mxu0 %v1116_v8 }
 0x3cf   :  { %1184 = vmatpush1.msra.mxu0 %v1115_v54  ;;  %1254 = vmatprep.subr.mxu1 %v1118_v52 }
 0x3d0   :  { %2448 = vmatmul.mubr.msk.f32.vlgmr.msra.gmra.mrb[4].mxu0 %vm433_vm8, %v2446_v42  ;;  %1255 = vmatpush1.msra.mxu1 %v1117_v45 }
 0x3d1   :  { %2449 = vmatmul.mubr.msk.f32.vlgmr.msra.gmra.mrb[4].mxu1 %vm433_vm8, %v2446_v42  ;;  %1585 = vmatprep.mubr.f32.mxu0 %v2695_v4 }
 0x3d2   :  { %1656 = vmatprep.mubr.f32.mxu1 %v2695_v4 }
 0x3db   :  { %v1162_v14 = vpop.permute.xlu1 %1161 }
 0x4a3   :  { %v1233_v5 = vpop.f32.mrb[4].mxu0 }
 0x4a4   :  { %v3441_v22 = vadd.f32 %v1233_v5, %v1162_v14  ;;  %v1235_v23 = vpop.f32.mrb[5].mxu0  ;;  %v1304_v13 = vpop.f32.mrb[4].mxu1 }
 0x4a5   :  { %v3443_v29 = vadd.f32 %v1235_v23, %v1162_v14  ;;  %v1306_v57 = vpop.f32.mrb[5].mxu1  ;;  %v3449_v43 = vadd.f32 %v1304_v13, %v1162_v14 }
 0x4a6   :  { %1313 = vrot.lane.b32.xlu0 %v3441_v22, %s2688_s9  ;;  %v3451_v37 = vadd.f32 %v1306_v57, %v1162_v14 }
 0x4a7   :  { %1315 = vrot.lane.b32.xlu1 %v3443_v29, %s2688_s9 }
 0x4aa   :  { %1317 = vrot.lane.b32.xlu0 %v3449_v43, %s2688_s9 }
 0x4ab   :  { %1319 = vrot.lane.b32.xlu1 %v3451_v37, %s2688_s9 }
 0x4ae   :  { %1333 = vrot.lane.b32.xlu0 %v3441_v22, %s2689_s14 }
 0x4af   :  { %1335 = vrot.lane.b32.xlu1 %v3443_v29, %s2689_s14 }
 0x4b2   :  { %1337 = vrot.lane.b32.xlu0 %v3449_v43, %s2689_s14 }
 0x4b3   :  { %1339 = vrot.lane.b32.xlu1 %v3451_v37, %s2689_s14 }
 0x4b6   :  { %1353 = vrot.lane.b32.xlu0 %v3441_v22, %s2690_s15 }
 0x4b7   :  { %1355 = vrot.lane.b32.xlu1 %v3443_v29, %s2690_s15 }
 0x4ba   :  { %1357 = vrot.lane.b32.xlu0 %v3449_v43, %s2690_s15 }
 0x4bb   :  { %1359 = vrot.lane.b32.xlu1 %v3451_v37, %s2690_s15 }
 0x4be   :  { %1373 = vrot.lane.b32.xlu0 %v3441_v22, %s2691_s16 }
 0x4bf   :  { %1375 = vrot.lane.b32.xlu1 %v3443_v29, %s2691_s16 }
 0x4c2   :  { %1377 = vrot.lane.b32.xlu0 %v3449_v43, %s2691_s16 }
 0x4c3   :  { %1379 = vrot.lane.b32.xlu1 %v3451_v37, %s2691_s16 }
 0x4c6   :  { %1397 = vrot.lane.b32.xlu0 %v3441_v22, %s2692_s17 }
 0x4c7   :  { %1399 = vrot.lane.b32.xlu1 %v3443_v29, %s2692_s17 }
 0x4ca   :  { %1401 = vrot.lane.b32.xlu0 %v3449_v43, %s2692_s17 }
 0x4cb   :  { %1403 = vrot.lane.b32.xlu1 %v3451_v37, %s2692_s17 }
 0x4ce   :  { %1417 = vrot.lane.b32.xlu0 %v3441_v22, %s2693_s18 }
 0x4cf   :  { %1419 = vrot.lane.b32.xlu1 %v3443_v29, %s2693_s18 }
 0x4d2   :  { %1421 = vrot.lane.b32.xlu0 %v3449_v43, %s2693_s18 }
 0x4d3   :  { %1423 = vrot.lane.b32.xlu1 %v3451_v37, %s2693_s18 }
 0x4d6   :  { %1437 = vrot.lane.b32.xlu0 %v3441_v22, %s2694_s19 }
 0x4d7   :  { %1439 = vrot.lane.b32.xlu1 %v3443_v29, %s2694_s19 }
 0x4da   :  { %1441 = vrot.lane.b32.xlu0 %v3449_v43, %s2694_s19 }
 0x4db   :  { %1443 = vrot.lane.b32.xlu1 %v3451_v37, %s2694_s19 }
 0x4de   :  { %1457 = vrot.lane.b32.xlu0 %v3441_v22, %s2697_s20 }
 0x4df   :  { %1459 = vrot.lane.b32.xlu1 %v3443_v29, %s2697_s20 }
 0x4e2   :  { %1461 = vrot.lane.b32.xlu0 %v3449_v43, %s2697_s20 }
 0x4e3   :  { %1463 = vrot.lane.b32.xlu1 %v3451_v37, %s2697_s20 }
 0x4e6   :  { %1515 = vperm.xlu0 %2666, %v2451_v19  }
 0x518   :  { %v1314_v6 = vpop.permute.xlu0 %1313 }
 0x519   :  { %v1316_v53 = vpop.permute.xlu1 %1315 }
 0x51a   :  { %v1323_v17 = vsel %vm60_vm0, %v1314_v6, %v1316_v53 }
 0x51b   :  { %v1326_v34 = vmul.f32 %v1323_v17, %v2851_v20 }
 0x51c   :  { %v1318_v15 = vpop.permute.xlu0 %1317 }
 0x51d   :  { %v1320_v12 = vpop.permute.xlu1 %1319  ;;  %v1322_v60 = vsel %vm60_vm0, %v1316_v53, %v1318_v15 }
 0x51e   :  { %v1321_v49 = vsel %vm60_vm0, %v1318_v15, %v1320_v12  ;;  %v1324_v55 = vsel %vm60_vm0, %v1320_v12, %v1314_v6  ;;  %v1327_v57 = vmul.f32 %v1322_v60, %v2875_v31 }
 0x51f   :  { %v1325_v14 = vmul.f32 %v1324_v55, %v2859_v25  ;;  %v1328_v5 = vmul.f32 %v1321_v49, %v2865_v27 }
 0x520   :  { %v1334_v18 = vpop.permute.xlu0 %1333 }
 0x521   :  { %v1336_v44 = vpop.permute.xlu1 %1335 }
 0x522   :  { %v1343_v32 = vsel %vm102_vm1, %v1334_v18, %v1336_v44 }
 0x523   :  { %v1346_v46 = vmul.f32 %v1343_v32, %v2854_v21 }
 0x524   :  { %v1338_v56 = vpop.permute.xlu0 %1337 }
 0x525   :  { %v1342_v7 = vsel %vm102_vm1, %v1336_v44, %v1338_v56  ;;  %v1340_v8 = vpop.permute.xlu1 %1339  ;;  %v2560_v54 = vpack.c.bf16 %v1346_v46, %v1326_v34 }
 0x526   :  { %v1347_v45 = vmul.f32 %v1342_v7, %v2882_v35  ;;  %v1341_v52 = vsel %vm102_vm1, %v1338_v56, %v1340_v8  ;;  %v1344_v42 = vsel %vm102_vm1, %v1340_v8, %v1334_v18 }
 0x527   :  { %v1345_v23 = vmul.f32 %v1344_v42, %v2862_v26  ;;  %v1348_v13 = vmul.f32 %v1341_v52, %v2872_v30  ;;  %2561 = vmatprep.subr.bf16.mxu0 %v2560_v54 }
 0x528   :  { %v1354_v19 = vpop.permute.xlu0 %1353  ;;  %v2578_v12 = vpack.c.bf16 %v1347_v45, %v1327_v57 }
 0x529   :  { %v2562_v6 = vpack.c.bf16 %v1345_v23, %v1325_v14  ;;  %v1356_v53 = vpop.permute.xlu1 %1355  ;;  %v2576_v15 = vpack.c.bf16 %v1348_v13, %v1328_v5 }
 0x52a   :  { %v1363_v44 = vsel %vm144_vm2, %v1354_v19, %v1356_v53 }
 0x52b   :  { %2563 = vmatpush1.bf16.msra.mxu0 %v2562_v6  ;;  %2577 = vmatprep.subr.bf16.mxu1 %v2576_v15  ;;  %v1366_v49 = vmul.f32 %v1363_v44, %v2907_v58 }
 0x52c   :  { %2579 = vmatpush1.bf16.msra.mxu1 %v2578_v12  ;;  %v1358_v17 = vpop.permute.xlu0 %1357 }
 0x52d   :  { %v1360_v18 = vpop.permute.xlu1 %1359  ;;  %v1362_v8 = vsel %vm144_vm2, %v1356_v53, %v1358_v17 }
 0x52e   :  { %v1361_v56 = vsel %vm144_vm2, %v1358_v17, %v1360_v18  ;;  %v1364_v60 = vsel %vm144_vm2, %v1360_v18, %v1354_v19  ;;  %v1367_v6 = vmul.f32 %v1362_v8, %v2918_v62 }
 0x52f   :  { %v1365_v23 = vmul.f32 %v1364_v60, %v2915_v61  ;;  %v1368_v13 = vmul.f32 %v1361_v56, %v2921_v63 }
 0x530   :  { %v1374_v32 = vpop.permute.xlu0 %1373 }
 0x531   :  { %v1376_v34 = vpop.permute.xlu1 %1375 }
 0x532   :  { %v1383_v46 = vsel %vm186_vm3, %v1374_v32, %v1376_v34 }
 0x533   :  { %v1386_v55 = vmul.f32 %v1383_v46, %v2910_v59 }
 0x534   :  { %v1378_v7 = vpop.permute.xlu0 %1377 }
 0x535   :  { %v1382_v54 = vsel %vm186_vm3, %v1376_v34, %v1378_v7  ;;  %v1380_v45 = vpop.permute.xlu1 %1379  ;;  %v2564_v52 = vpack.c.bf16 %v1386_v55, %v1366_v49 }
 0x536   :  { %v1387_v42 = vmul.f32 %v1382_v54, %v2931_v10  ;;  %v1381_v14 = vsel %vm186_vm3, %v1378_v7, %v1380_v45  ;;  %v1384_v5 = vsel %vm186_vm3, %v1380_v45, %v1374_v32 }
 0x537   :  { %v1385_v57 = vmul.f32 %v1384_v5, %v2928_v9  ;;  %v1388_v19 = vmul.f32 %v1381_v14, %v2938_v16  ;;  %2565 = vmatprep.subr.bf16.mxu0 %v2564_v52 }
 0x538   :  { %v1398_v53 = vpop.permute.xlu0 %1397  ;;  %v2582_v18 = vpack.c.bf16 %v1387_v42, %v1367_v6 }
 0x539   :  { %v2566_v15 = vpack.c.bf16 %v1385_v57, %v1365_v23  ;;  %v1400_v12 = vpop.permute.xlu1 %1399  ;;  %v2580_v17 = vpack.c.bf16 %v1388_v19, %v1368_v13 }
 0x53a   :  { %v1407_v44 = vsel %vm232_vm4, %v1398_v53, %v1400_v12 }
 0x53b   :  { %2567 = vmatpush1.bf16.msra.mxu0 %v2566_v15  ;;  %2581 = vmatprep.subr.bf16.mxu1 %v2580_v17  ;;  %v1409_v34 = vmul.f32 %v1407_v44, %v2959_v47 }
 0x53c   :  { %2583 = vmatpush1.bf16.msra.mxu1 %v2582_v18  ;;  %v1402_v32 = vpop.permute.xlu0 %1401 }
 0x53d   :  { %v1406_v46 = vsel %vm232_vm4, %v1400_v12, %v1402_v32  ;;  %v1404_v49 = vpop.permute.xlu1 %1403  ;;  %v2570_v52 = vpack.c.bf16 %v1409_v34, %v3441_v22 }
 0x53e   :  { %v1410_v55 = vmul.f32 %v1406_v46, %v2967_v50  ;;  %v1405_v56 = vsel %vm232_vm4, %v1402_v32, %v1404_v49  ;;  %v1408_v60 = vsel %vm232_vm4, %v1404_v49, %v1398_v53 }
 0x53f   :  { %v1411_v7 = vmul.f32 %v1405_v56, %v2970_v51  ;;  %v1412_v8 = vmul.f32 %v1408_v60, %v2962_v48 }
 0x540   :  { %v1418_v54 = vpop.permute.xlu0 %1417  ;;  %v2568_v45 = vpack.c.bf16 %v1410_v55, %v3443_v29 }
 0x541   :  { %v2586_v42 = vpack.c.bf16 %v1411_v7, %v3449_v43  ;;  %v1420_v14 = vpop.permute.xlu1 %1419  ;;  %v2584_v5 = vpack.c.bf16 %v1412_v8, %v3451_v37 }
 0x542   :  { %2569 = vmatprep.subr.bf16.mxu0 %v2568_v45  ;;  %v1427_v6 = vsel %vm274_vm6, %v1418_v54, %v1420_v14 }
 0x543   :  { %2571 = vmatpush1.bf16.msra.mxu0 %v2570_v52  ;;  %2585 = vmatprep.subr.bf16.mxu1 %v2584_v5  ;;  %v1429_v15 = vmul.f32 %v1427_v6, %v3022_v41 }
 0x544   :  { %2587 = vmatpush1.bf16.msra.mxu1 %v2586_v42  ;;  %v1422_v23 = vpop.permute.xlu0 %1421 }
 0x545   :  { %v1424_v13 = vpop.permute.xlu1 %1423  ;;  %v1426_v22 = vsel %vm274_vm6, %v1420_v14, %v1422_v23 }
 0x546   :  { %v1425_v43 = vsel %vm274_vm6, %v1422_v23, %v1424_v13  ;;  %v1428_v37 = vsel %vm274_vm6, %v1424_v13, %v1418_v54  ;;  %v1430_v44 = vmul.f32 %v1426_v22, %v2998_v1 }
 0x547   :  { %v1431_v49 = vmul.f32 %v1425_v43, %v3003_v33  ;;  %v1432_v55 = vmul.f32 %v1428_v37, %v2995_v0  ;;  %v2450_v37 = vld [vmem:[%s4008_s4 + $0x10] sm:$0xff] }
 0x548   :  { %v1438_v57 = vpop.permute.xlu0 %1437 }
 0x549   :  { %v1440_v19 = vpop.permute.xlu1 %1439 }
 0x54a   :  { %v1447_v29 = vsel %vm316_vm5, %v1438_v57, %v1440_v19 }
 0x54b   :  { %v1449_v12 = vmul.f32 %v1447_v29, %v3008_v36 }
 0x54c   :  { %v1442_v53 = vpop.permute.xlu0 %1441 }
 0x54d   :  { %v1446_v17 = vsel %vm316_vm5, %v1440_v19, %v1442_v53  ;;  %v1444_v18 = vpop.permute.xlu1 %1443  ;;  %v2574_v54 = vpack.c.bf16 %v1449_v12, %v1429_v15 }
 0x54e   :  { %v1450_v32 = vmul.f32 %v1446_v17, %v3016_v39  ;;  %v1445_v34 = vsel %vm316_vm5, %v1442_v53, %v1444_v18  ;;  %v1448_v46 = vsel %vm316_vm5, %v1444_v18, %v1438_v57 }
 0x54f   :  { %v1451_v56 = vmul.f32 %v1445_v34, %v3019_v40  ;;  %v1452_v60 = vmul.f32 %v1448_v46, %v3013_v38 }
 0x550   :  { %v1458_v7 = vpop.permute.xlu0 %1457  ;;  %v2572_v8 = vpack.c.bf16 %v1450_v32, %v1430_v44 }
 0x551   :  { %v2590_v45 = vpack.c.bf16 %v1451_v56, %v1431_v49  ;;  %v1460_v52 = vpop.permute.xlu1 %1459  ;;  %v2588_v42 = vpack.c.bf16 %v1452_v60, %v1432_v55 }
 0x552   :  { %2573 = vmatprep.subr.bf16.mxu0 %v2572_v8  ;;  %v1467_v14 = vsel %vm358_vm7, %v1458_v7, %v1460_v52 }
 0x553   :  { %2575 = vmatpush1.bf16.msra.mxu0 %v2574_v54  ;;  %2589 = vmatprep.subr.bf16.mxu1 %v2588_v42  ;;  %v1469_v29 = vmul.f32 %v1467_v14, %v3056_v3 }
 0x554   :  { %2591 = vmatpush1.bf16.msra.mxu1 %v2590_v45  ;;  %v1462_v5 = vpop.permute.xlu0 %1461 }
 0x555   :  { %v1466_v23 = vsel %vm358_vm7, %v1460_v52, %v1462_v5  ;;  %v1464_v13 = vpop.permute.xlu1 %1463  ;;  %v2455_v52 = vld [vmem:[%s4007_s5 + $0x18] sm:$0xff] }
 0x556   :  { %v1470_v57 = vmul.f32 %v1466_v23, %v3047_v24  ;;  %v1465_v19 = vsel %vm358_vm7, %v1462_v5, %v1464_v13  ;;  %v1468_v6 = vsel %vm358_vm7, %v1464_v13, %v1458_v7 }
 0x557   :  { %v1471_v22 = vmul.f32 %v1465_v19, %v3053_v2  ;;  %v1472_v43 = vmul.f32 %v1468_v6, %v3050_v28 }
 0x558   :  { %1537 = vmatprep.subr.mxu0 %v1470_v57 }
 0x559   :  { %1538 = vmatpush1.msra.mxu0 %v1469_v29  ;;  %1608 = vmatprep.subr.mxu1 %v1472_v43 }
 0x55a   :  { %2452 = vmatmul.mubr.msk.f32.vlgmr.msra.gmra.mrb[6].mxu0 %vm433_vm8, %v2450_v37  ;;  %1609 = vmatpush1.msra.mxu1 %v1471_v22 }
 0x55b   :  { %2453 = vmatmul.mubr.msk.f32.vlgmr.msra.gmra.mrb[6].mxu1 %vm433_vm8, %v2450_v37  ;;  %1951 = vmatprep.mubr.f32.mxu0 %v2695_v4 }
 0x55c   :  { %2022 = vmatprep.mubr.f32.mxu1 %v2695_v4 }
 0x565   :  { %v1516_v53 = vpop.permute.xlu0 %1515 }
 0x62d   :  { %v1587_v15 = vpop.f32.mrb[6].mxu0 }
 0x62e   :  { %v1588_v12 = vadd.f32 %v1587_v15, %v1516_v53  ;;  %v1589_v17 = vpop.f32.mrb[7].mxu0  ;;  %v1658_v18 = vpop.f32.mrb[6].mxu1 }
 0x62f   :  { %v1590_v44 = vadd.f32 %v1589_v17, %v1516_v53  ;;  %v1659_v32 = vadd.f32 %v1658_v18, %v1516_v53  ;;  %v1660_v34 = vpop.f32.mrb[7].mxu1 }
 0x630   :  { %vm1663_vm10 = vcmp.ge.f32.partialorder %v1588_v12, 0.0  ;;  %v1667_v46 = vmul.f32 0.1, %v1588_v12  ;;  %v1661_v49 = vadd.f32 %v1660_v34, %v1516_v53 }
 0x631   :  { %vm1664_vm11 = vcmp.ge.f32.partialorder %v1590_v44, 0.0  ;;  %v1668_v55 = vmul.f32 0.1, %v1590_v44  ;;  %v1669_v60 = vmul.f32 0.1, %v1659_v32  ;;  %vm1665_vm12 = vcmp.ge.f32.partialorder %v1659_v32, 0.0 }
 0x632   :  { %v3623_v56 = vsel %vm1663_vm10, %v1588_v12, %v1667_v46  ;;  %v1670_v8 = vmul.f32 0.1, %v1661_v49  ;;  %vm1666_vm13 = vcmp.ge.f32.partialorder %v1661_v49, 0.0 }
 0x633   :  { %v3625_v7 = vsel %vm1664_vm11, %v1590_v44, %v1668_v55  ;;  %1679 = vrot.lane.b32.xlu1 %v3623_v56, %s2688_s9  ;;  %v3631_v54 = vsel %vm1665_vm12, %v1659_v32, %v1669_v60 }
 0x634   :  { %1681 = vrot.lane.b32.xlu0 %v3625_v7, %s2688_s9  ;;  %v3633_v45 = vsel %vm1666_vm13, %v1661_v49, %v1670_v8 }
 0x637   :  { %1683 = vrot.lane.b32.xlu1 %v3631_v54, %s2688_s9 }
 0x638   :  { %1685 = vrot.lane.b32.xlu0 %v3633_v45, %s2688_s9 }
 0x63b   :  { %1699 = vrot.lane.b32.xlu1 %v3623_v56, %s2689_s14 }
 0x63c   :  { %1701 = vrot.lane.b32.xlu0 %v3625_v7, %s2689_s14 }
 0x63f   :  { %1703 = vrot.lane.b32.xlu1 %v3631_v54, %s2689_s14 }
 0x640   :  { %1705 = vrot.lane.b32.xlu0 %v3633_v45, %s2689_s14 }
 0x643   :  { %1719 = vrot.lane.b32.xlu1 %v3623_v56, %s2690_s15 }
 0x644   :  { %1721 = vrot.lane.b32.xlu0 %v3625_v7, %s2690_s15 }
 0x647   :  { %1723 = vrot.lane.b32.xlu1 %v3631_v54, %s2690_s15 }
 0x648   :  { %1725 = vrot.lane.b32.xlu0 %v3633_v45, %s2690_s15 }
 0x64b   :  { %1739 = vrot.lane.b32.xlu1 %v3623_v56, %s2691_s16 }
 0x64c   :  { %1741 = vrot.lane.b32.xlu0 %v3625_v7, %s2691_s16 }
 0x64f   :  { %1743 = vrot.lane.b32.xlu1 %v3631_v54, %s2691_s16 }
 0x650   :  { %1745 = vrot.lane.b32.xlu0 %v3633_v45, %s2691_s16 }
 0x653   :  { %1763 = vrot.lane.b32.xlu1 %v3623_v56, %s2692_s17 }
 0x654   :  { %1765 = vrot.lane.b32.xlu0 %v3625_v7, %s2692_s17 }
 0x657   :  { %1767 = vrot.lane.b32.xlu1 %v3631_v54, %s2692_s17 }
 0x658   :  { %1769 = vrot.lane.b32.xlu0 %v3633_v45, %s2692_s17 }
 0x65b   :  { %1783 = vrot.lane.b32.xlu1 %v3623_v56, %s2693_s18 }
 0x65c   :  { %1785 = vrot.lane.b32.xlu0 %v3625_v7, %s2693_s18 }
 0x65f   :  { %1787 = vrot.lane.b32.xlu1 %v3631_v54, %s2693_s18 }
 0x660   :  { %1789 = vrot.lane.b32.xlu0 %v3633_v45, %s2693_s18 }
 0x663   :  { %1803 = vrot.lane.b32.xlu1 %v3623_v56, %s2694_s19 }
 0x664   :  { %1805 = vrot.lane.b32.xlu0 %v3625_v7, %s2694_s19 }
 0x667   :  { %1807 = vrot.lane.b32.xlu1 %v3631_v54, %s2694_s19 }
 0x668   :  { %1809 = vrot.lane.b32.xlu0 %v3633_v45, %s2694_s19 }
 0x66b   :  { %1823 = vrot.lane.b32.xlu1 %v3623_v56, %s2697_s20 }
 0x66c   :  { %1825 = vrot.lane.b32.xlu0 %v3625_v7, %s2697_s20 }
 0x66f   :  { %1827 = vrot.lane.b32.xlu1 %v3631_v54, %s2697_s20 }
 0x670   :  { %1829 = vrot.lane.b32.xlu0 %v3633_v45, %s2697_s20 }
 0x673   :  { %1881 = vperm.xlu1 %2667, %v2455_v52  }
 0x6a5   :  { %v1680_v42 = vpop.permute.xlu1 %1679 }
 0x6a6   :  { %v1682_v14 = vpop.permute.xlu0 %1681 }
 0x6a7   :  { %v1689_v13 = vsel %vm60_vm0, %v1680_v42, %v1682_v14 }
 0x6a8   :  { %v1692_v29 = vmul.f32 %v1689_v13, %v2851_v20 }
 0x6a9   :  { %v1684_v5 = vpop.permute.xlu1 %1683 }
 0x6aa   :  { %v1686_v23 = vpop.permute.xlu0 %1685  ;;  %v1688_v15 = vsel %vm60_vm0, %v1682_v14, %v1684_v5 }
 0x6ab   :  { %v1687_v43 = vsel %vm60_vm0, %v1684_v5, %v1686_v23  ;;  %v1690_v37 = vsel %vm60_vm0, %v1686_v23, %v1680_v42  ;;  %v1693_v8 = vmul.f32 %v1688_v15, %v2875_v31 }
 0x6ac   :  { %v1691_v46 = vmul.f32 %v1690_v37, %v2859_v25  ;;  %v1694_v49 = vmul.f32 %v1687_v43, %v2865_v27 }
 0x6ad   :  { %v1700_v57 = vpop.permute.xlu1 %1699 }
 0x6ae   :  { %v1702_v19 = vpop.permute.xlu0 %1701 }
 0x6af   :  { %v1709_v6 = vsel %vm102_vm1, %v1700_v57, %v1702_v19 }
 0x6b0   :  { %v1712_v22 = vmul.f32 %v1709_v6, %v2854_v21 }
 0x6b1   :  { %v1704_v53 = vpop.permute.xlu1 %1703 }
 0x6b2   :  { %v1708_v12 = vsel %vm102_vm1, %v1702_v19, %v1704_v53  ;;  %v1706_v17 = vpop.permute.xlu0 %1705  ;;  %v2592_v18 = vpack.c.bf16 %v1712_v22, %v1692_v29 }
 0x6b3   :  { %v1713_v44 = vmul.f32 %v1708_v12, %v2882_v35  ;;  %v1707_v32 = vsel %vm102_vm1, %v1704_v53, %v1706_v17  ;;  %v1710_v34 = vsel %vm102_vm1, %v1706_v17, %v1700_v57 }
 0x6b4   :  { %v1711_v55 = vmul.f32 %v1710_v34, %v2862_v26  ;;  %v1714_v60 = vmul.f32 %v1707_v32, %v2872_v30  ;;  %2593 = vmatprep.subr.bf16.mxu0 %v2592_v18 }
 0x6b5   :  { %v1720_v52 = vpop.permute.xlu1 %1719  ;;  %v2610_v23 = vpack.c.bf16 %v1713_v44, %v1693_v8 }
 0x6b6   :  { %v2594_v42 = vpack.c.bf16 %v1711_v55, %v1691_v46  ;;  %v1722_v14 = vpop.permute.xlu0 %1721  ;;  %v2608_v5 = vpack.c.bf16 %v1714_v60, %v1694_v49 }
 0x6b7   :  { %v1729_v19 = vsel %vm144_vm2, %v1720_v52, %v1722_v14 }
 0x6b8   :  { %2595 = vmatpush1.bf16.msra.mxu0 %v2594_v42  ;;  %2609 = vmatprep.subr.bf16.mxu1 %v2608_v5  ;;  %v1732_v43 = vmul.f32 %v1729_v19, %v2907_v58 }
 0x6b9   :  { %2611 = vmatpush1.bf16.msra.mxu1 %v2610_v23  ;;  %v1724_v13 = vpop.permute.xlu1 %1723 }
 0x6ba   :  { %v1726_v57 = vpop.permute.xlu0 %1725  ;;  %v1728_v17 = vsel %vm144_vm2, %v1722_v14, %v1724_v13 }
 0x6bb   :  { %v1727_v53 = vsel %vm144_vm2, %v1724_v13, %v1726_v57  ;;  %v1730_v15 = vsel %vm144_vm2, %v1726_v57, %v1720_v52  ;;  %v1733_v42 = vmul.f32 %v1728_v17, %v2918_v62 }
 0x6bc   :  { %v1731_v55 = vmul.f32 %v1730_v15, %v2915_v61  ;;  %v1734_v60 = vmul.f32 %v1727_v53, %v2921_v63 }
 0x6bd   :  { %v1740_v6 = vpop.permute.xlu1 %1739 }
 0x6be   :  { %v1742_v29 = vpop.permute.xlu0 %1741 }
 0x6bf   :  { %v1749_v22 = vsel %vm186_vm3, %v1740_v6, %v1742_v29 }
 0x6c0   :  { %v1752_v37 = vmul.f32 %v1749_v22, %v2910_v59 }
 0x6c1   :  { %v1744_v12 = vpop.permute.xlu1 %1743 }
 0x6c2   :  { %v1748_v18 = vsel %vm186_vm3, %v1742_v29, %v1744_v12  ;;  %v1746_v44 = vpop.permute.xlu0 %1745  ;;  %v2596_v32 = vpack.c.bf16 %v1752_v37, %v1732_v43 }
 0x6c3   :  { %v1753_v34 = vmul.f32 %v1748_v18, %v2931_v10  ;;  %v1747_v46 = vsel %vm186_vm3, %v1744_v12, %v1746_v44  ;;  %v1750_v49 = vsel %vm186_vm3, %v1746_v44, %v1740_v6 }
 0x6c4   :  { %v1751_v8 = vmul.f32 %v1750_v49, %v2928_v9  ;;  %v1754_v52 = vmul.f32 %v1747_v46, %v2938_v16  ;;  %2597 = vmatprep.subr.bf16.mxu0 %v2596_v32 }
 0x6c5   :  { %v1764_v14 = vpop.permute.xlu1 %1763  ;;  %v2614_v57 = vpack.c.bf16 %v1753_v34, %v1733_v42 }
 0x6c6   :  { %v2598_v5 = vpack.c.bf16 %v1751_v8, %v1731_v55  ;;  %v1766_v23 = vpop.permute.xlu0 %1765  ;;  %v2612_v13 = vpack.c.bf16 %v1754_v52, %v1734_v60 }
 0x6c7   :  { %v1773_v19 = vsel %vm232_vm4, %v1764_v14, %v1766_v23 }
 0x6c8   :  { %2599 = vmatpush1.bf16.msra.mxu0 %v2598_v5  ;;  %2613 = vmatprep.subr.bf16.mxu1 %v2612_v13  ;;  %v1775_v29 = vmul.f32 %v1773_v19, %v2959_v47 }
 0x6c9   :  { %2615 = vmatpush1.bf16.msra.mxu1 %v2614_v57  ;;  %v1768_v6 = vpop.permute.xlu1 %1767 }
 0x6ca   :  { %v1772_v22 = vsel %vm232_vm4, %v1766_v23, %v1768_v6  ;;  %v1770_v43 = vpop.permute.xlu0 %1769  ;;  %v2602_v32 = vpack.c.bf16 %v1775_v29, %v3623_v56 }
 0x6cb   :  { %v1776_v37 = vmul.f32 %v1772_v22, %v2967_v50  ;;  %v1771_v53 = vsel %vm232_vm4, %v1768_v6, %v1770_v43  ;;  %v1774_v15 = vsel %vm232_vm4, %v1770_v43, %v1764_v14 }
 0x6cc   :  { %v1777_v12 = vmul.f32 %v1771_v53, %v2970_v51  ;;  %v1778_v17 = vmul.f32 %v1774_v15, %v2962_v48 }
 0x6cd   :  { %v1784_v18 = vpop.permute.xlu1 %1783  ;;  %v2600_v44 = vpack.c.bf16 %v1776_v37, %v3625_v7 }
 0x6ce   :  { %v2618_v34 = vpack.c.bf16 %v1777_v12, %v3631_v54  ;;  %v1786_v46 = vpop.permute.xlu0 %1785  ;;  %v2616_v49 = vpack.c.bf16 %v1778_v17, %v3633_v45 }
 0x6cf   :  { %2601 = vmatprep.subr.bf16.mxu0 %v2600_v44  ;;  %v1793_v42 = vsel %vm274_vm6, %v1784_v18, %v1786_v46 }
 0x6d0   :  { %2603 = vmatpush1.bf16.msra.mxu0 %v2602_v32  ;;  %2617 = vmatprep.subr.bf16.mxu1 %v2616_v49  ;;  %v1795_v5 = vmul.f32 %v1793_v42, %v3022_v41 }
 0x6d1   :  { %2619 = vmatpush1.bf16.msra.mxu1 %v2618_v34  ;;  %v1788_v55 = vpop.permute.xlu1 %1787 }
 0x6d2   :  { %v1790_v60 = vpop.permute.xlu0 %1789  ;;  %v1792_v56 = vsel %vm274_vm6, %v1786_v46, %v1788_v55 }
 0x6d3   :  { %v1791_v54 = vsel %vm274_vm6, %v1788_v55, %v1790_v60  ;;  %v1794_v45 = vsel %vm274_vm6, %v1790_v60, %v1784_v18  ;;  %v1796_v19 = vmul.f32 %v1792_v56, %v2998_v1 }
 0x6d4   :  { %v1797_v43 = vmul.f32 %v1791_v54, %v3003_v33  ;;  %v1798_v37 = vmul.f32 %v1794_v45, %v2995_v0  ;;  %v2454_v45 = vld [vmem:[%s4008_s4 + $0x18] sm:$0xff] }
 0x6d5   :  { %v1804_v8 = vpop.permute.xlu1 %1803 }
 0x6d6   :  { %v1806_v52 = vpop.permute.xlu0 %1805 }
 0x6d7   :  { %v1813_v7 = vsel %vm316_vm5, %v1804_v8, %v1806_v52 }
 0x6d8   :  { %v1815_v23 = vmul.f32 %v1813_v7, %v3008_v36 }
 0x6d9   :  { %v1808_v14 = vpop.permute.xlu1 %1807 }
 0x6da   :  { %v1812_v13 = vsel %vm316_vm5, %v1806_v52, %v1808_v14  ;;  %v1810_v57 = vpop.permute.xlu0 %1809  ;;  %v2606_v18 = vpack.c.bf16 %v1815_v23, %v1795_v5 }
 0x6db   :  { %v1816_v6 = vmul.f32 %v1812_v13, %v3016_v39  ;;  %v1811_v29 = vsel %vm316_vm5, %v1808_v14, %v1810_v57  ;;  %v1814_v22 = vsel %vm316_vm5, %v1810_v57, %v1804_v8 }
 0x6dc   :  { %v1817_v53 = vmul.f32 %v1811_v29, %v3019_v40  ;;  %v1818_v15 = vmul.f32 %v1814_v22, %v3013_v38 }
 0x6dd   :  { %v1824_v12 = vpop.permute.xlu1 %1823  ;;  %v2604_v17 = vpack.c.bf16 %v1816_v6, %v1796_v19 }
 0x6de   :  { %v2622_v44 = vpack.c.bf16 %v1817_v53, %v1797_v43  ;;  %v1826_v32 = vpop.permute.xlu0 %1825  ;;  %v2620_v34 = vpack.c.bf16 %v1818_v15, %v1798_v37 }
 0x6df   :  { %2605 = vmatprep.subr.bf16.mxu0 %v2604_v17  ;;  %v1833_v46 = vsel %vm358_vm7, %v1824_v12, %v1826_v32 }
 0x6e0   :  { %2607 = vmatpush1.bf16.msra.mxu0 %v2606_v18  ;;  %2621 = vmatprep.subr.bf16.mxu1 %v2620_v34  ;;  %v1835_v7 = vmul.f32 %v1833_v46, %v3056_v3 }
 0x6e1   :  { %2623 = vmatpush1.bf16.msra.mxu1 %v2622_v44  ;;  %v1828_v49 = vpop.permute.xlu1 %1827  ;;  %v2042_v44 = vld [vmem:[%s4009_s7] sm:$0xff] }
 0x6e2   :  { %v1832_v55 = vsel %vm358_vm7, %v1826_v32, %v1828_v49  ;;  %v1830_v60 = vpop.permute.xlu0 %1829 }
 0x6e3   :  { %v1836_v8 = vmul.f32 %v1832_v55, %v3047_v24  ;;  %v1831_v52 = vsel %vm358_vm7, %v1828_v49, %v1830_v60  ;;  %v1834_v42 = vsel %vm358_vm7, %v1830_v60, %v1824_v12 }
 0x6e4   :  { %v1837_v56 = vmul.f32 %v1831_v52, %v3053_v2  ;;  %v1838_v54 = vmul.f32 %v1834_v42, %v3050_v28 }
 0x6e5   :  { %1903 = vmatprep.subr.mxu0 %v1836_v8 }
 0x6e6   :  { %1904 = vmatpush1.msra.mxu0 %v1835_v7  ;;  %1974 = vmatprep.subr.mxu1 %v1838_v54 }
 0x6e7   :  { %2456 = vmatmul.mubr.msk.f32.vlgmr.msra.gmra.mrb[8].mxu0 %vm433_vm8, %v2454_v45  ;;  %1975 = vmatpush1.msra.mxu1 %v1837_v56 }
 0x6e8   :  { %2457 = vmatmul.mubr.msk.f32.vlgmr.msra.gmra.mrb[8].mxu1 %vm433_vm8, %v2454_v45  ;;  %2315 = vmatprep.mubr.f32.mxu0 %v2695_v4 }
 0x6e9   :  { %2386 = vmatprep.mubr.f32.mxu1 %v2695_v4 }
 0x6f2   :  { %v1882_v14 = vpop.permute.xlu1 %1881 }
 0x7ba   :  { %v1953_v5 = vpop.f32.mrb[8].mxu0 }
 0x7bb   :  { %v1954_v23 = vadd.f32 %v1953_v5, %v1882_v14  ;;  %v1955_v13 = vpop.f32.mrb[9].mxu0  ;;  %v2024_v57 = vpop.f32.mrb[8].mxu1 }
 0x7bc   :  { %v1956_v19 = vadd.f32 %v1955_v13, %v1882_v14  ;;  %v2025_v6 = vadd.f32 %v2024_v57, %v1882_v14  ;;  %v2026_v29 = vpop.f32.mrb[9].mxu1 }
 0x7bd   :  { %vm2029_vm14 = vcmp.ge.f32.partialorder %v1954_v23, 0.0  ;;  %v2033_v22 = vmul.f32 0.1, %v1954_v23  ;;  %v2027_v43 = vadd.f32 %v2026_v29, %v1882_v14 }
 0x7be   :  { %vm2030_vm15 = vcmp.ge.f32.partialorder %v1956_v19, 0.0  ;;  %v2034_v37 = vmul.f32 0.1, %v1956_v19  ;;  %v2035_v15 = vmul.f32 0.1, %v2025_v6  ;;  %vm2031_vm9 = vcmp.ge.f32.partialorder %v2025_v6, 0.0 }
 0x7bf   :  { %v3805_v53 = vsel %vm2029_vm14, %v1954_v23, %v2033_v22  ;;  %v2036_v4 = vmul.f32 0.1, %v2027_v43  ;;  %vm2032_vm10 = vcmp.ge.f32.partialorder %v2027_v43, 0.0 }
 0x7c0   :  { %v3807_v12 = vsel %vm2030_vm15, %v1956_v19, %v2034_v37  ;;  %2043 = vrot.lane.b32.xlu0 %v3805_v53, %s2688_s9  ;;  %v3813_v17 = vsel %vm2031_vm9, %v2025_v6, %v2035_v15 }
 0x7c1   :  { %2045 = vrot.lane.b32.xlu1 %v3807_v12, %s2688_s9  ;;  %v3815_v18 = vsel %vm2032_vm10, %v2027_v43, %v2036_v4 }
 0x7c4   :  { %2047 = vrot.lane.b32.xlu0 %v3813_v17, %s2688_s9 }
 0x7c5   :  { %2049 = vrot.lane.b32.xlu1 %v3815_v18, %s2688_s9 }
 0x7c8   :  { %2063 = vrot.lane.b32.xlu0 %v3805_v53, %s2689_s14 }
 0x7c9   :  { %2065 = vrot.lane.b32.xlu1 %v3807_v12, %s2689_s14 }
 0x7cc   :  { %2067 = vrot.lane.b32.xlu0 %v3813_v17, %s2689_s14 }
 0x7cd   :  { %2069 = vrot.lane.b32.xlu1 %v3815_v18, %s2689_s14 }
 0x7d0   :  { %2083 = vrot.lane.b32.xlu0 %v3805_v53, %s2690_s15 }
 0x7d1   :  { %2085 = vrot.lane.b32.xlu1 %v3807_v12, %s2690_s15 }
 0x7d4   :  { %2087 = vrot.lane.b32.xlu0 %v3813_v17, %s2690_s15 }
 0x7d5   :  { %2089 = vrot.lane.b32.xlu1 %v3815_v18, %s2690_s15 }
 0x7d8   :  { %2103 = vrot.lane.b32.xlu0 %v3805_v53, %s2691_s16 }
 0x7d9   :  { %2105 = vrot.lane.b32.xlu1 %v3807_v12, %s2691_s16 }
 0x7dc   :  { %2107 = vrot.lane.b32.xlu0 %v3813_v17, %s2691_s16 }
 0x7dd   :  { %2109 = vrot.lane.b32.xlu1 %v3815_v18, %s2691_s16 }
 0x7e0   :  { %2127 = vrot.lane.b32.xlu0 %v3805_v53, %s2692_s17 }
 0x7e1   :  { %2129 = vrot.lane.b32.xlu1 %v3807_v12, %s2692_s17 }
 0x7e4   :  { %2131 = vrot.lane.b32.xlu0 %v3813_v17, %s2692_s17 }
 0x7e5   :  { %2133 = vrot.lane.b32.xlu1 %v3815_v18, %s2692_s17 }
 0x7e8   :  { %2147 = vrot.lane.b32.xlu0 %v3805_v53, %s2693_s18 }
 0x7e9   :  { %2149 = vrot.lane.b32.xlu1 %v3807_v12, %s2693_s18 }
 0x7ec   :  { %2151 = vrot.lane.b32.xlu0 %v3813_v17, %s2693_s18 }
 0x7ed   :  { %2153 = vrot.lane.b32.xlu1 %v3815_v18, %s2693_s18 }
 0x7f0   :  { %2167 = vrot.lane.b32.xlu0 %v3805_v53, %s2694_s19 }
 0x7f1   :  { %2169 = vrot.lane.b32.xlu1 %v3807_v12, %s2694_s19 }
 0x7f4   :  { %2171 = vrot.lane.b32.xlu0 %v3813_v17, %s2694_s19 }
 0x7f5   :  { %2173 = vrot.lane.b32.xlu1 %v3815_v18, %s2694_s19 }
 0x7f8   :  { %2187 = vrot.lane.b32.xlu0 %v3805_v53, %s2697_s20 }
 0x7f9   :  { %2189 = vrot.lane.b32.xlu1 %v3807_v12, %s2697_s20 }
 0x7fc   :  { %2191 = vrot.lane.b32.xlu0 %v3813_v17, %s2697_s20 }
 0x7fd   :  { %2193 = vrot.lane.b32.xlu1 %v3815_v18, %s2697_s20 }
 0x800   :  { %2245 = vperm.xlu0 %2666, %v2042_v44  }
 0x832   :  { %v2044_v32 = vpop.permute.xlu0 %2043 }
 0x833   :  { %v2046_v34 = vpop.permute.xlu1 %2045 }
 0x834   :  { %v2053_v55 = vsel %vm60_vm0, %v2044_v32, %v2046_v34 }
 0x835   :  { %v2056_v42 = vmul.f32 %v2053_v55, %v2851_v20 }
 0x836   :  { %v2048_v46 = vpop.permute.xlu0 %2047 }
 0x837   :  { %v2050_v49 = vpop.permute.xlu1 %2049  ;;  %v2052_v14 = vsel %vm60_vm0, %v2046_v34, %v2048_v46 }
 0x838   :  { %v2051_v56 = vsel %vm60_vm0, %v2048_v46, %v2050_v49  ;;  %v2054_v54 = vsel %vm60_vm0, %v2050_v49, %v2044_v32  ;;  %v2057_v43 = vmul.f32 %v2052_v14, %v2875_v31 }
 0x839   :  { %v2055_v19 = vmul.f32 %v2054_v54, %v2859_v25  ;;  %v2058_v6 = vmul.f32 %v2051_v56, %v2865_v27 }
 0x83a   :  { %v2064_v60 = vpop.permute.xlu0 %2063 }
 0x83b   :  { %v2066_v8 = vpop.permute.xlu1 %2065 }
 0x83c   :  { %v2073_v52 = vsel %vm102_vm1, %v2064_v60, %v2066_v8 }
 0x83d   :  { %v2076_v7 = vmul.f32 %v2073_v52, %v2854_v21 }
 0x83e   :  { %v2068_v45 = vpop.permute.xlu0 %2067 }
 0x83f   :  { %v2072_v5 = vsel %vm102_vm1, %v2066_v8, %v2068_v45  ;;  %v2070_v23 = vpop.permute.xlu1 %2069  ;;  %v2624_v13 = vpack.c.bf16 %v2076_v7, %v2056_v42 }
 0x840   :  { %v2077_v57 = vmul.f32 %v2072_v5, %v2882_v35  ;;  %v2071_v20 = vsel %vm102_vm1, %v2068_v45, %v2070_v23  ;;  %v2074_v21 = vsel %vm102_vm1, %v2070_v23, %v2064_v60 }
 0x841   :  { %v2075_v29 = vmul.f32 %v2074_v21, %v2862_v26  ;;  %v2078_v22 = vmul.f32 %v2071_v20, %v2872_v30  ;;  %2625 = vmatprep.subr.bf16.mxu0 %v2624_v13 }
 0x842   :  { %v2084_v37 = vpop.permute.xlu0 %2083  ;;  %v2642_v44 = vpack.c.bf16 %v2077_v57, %v2057_v43 }
 0x843   :  { %v2626_v15 = vpack.c.bf16 %v2075_v29, %v2055_v19  ;;  %v2086_v35 = vpop.permute.xlu1 %2085  ;;  %v2640_v4 = vpack.c.bf16 %v2078_v22, %v2058_v6 }
 0x844   :  { %v2093_v25 = vsel %vm144_vm2, %v2084_v37, %v2086_v35 }
 0x845   :  { %2627 = vmatpush1.bf16.msra.mxu0 %v2626_v15  ;;  %2641 = vmatprep.subr.bf16.mxu1 %v2640_v4  ;;  %v2096_v31 = vmul.f32 %v2093_v25, %v2907_v58 }
 0x846   :  { %2643 = vmatpush1.bf16.msra.mxu1 %v2642_v44  ;;  %v2088_v32 = vpop.permute.xlu0 %2087 }
 0x847   :  { %v2090_v34 = vpop.permute.xlu1 %2089  ;;  %v2092_v8 = vsel %vm144_vm2, %v2086_v35, %v2088_v32 }
 0x848   :  { %v2091_v49 = vsel %vm144_vm2, %v2088_v32, %v2090_v34  ;;  %v2094_v55 = vsel %vm144_vm2, %v2090_v34, %v2084_v37  ;;  %v2097_v23 = vmul.f32 %v2092_v8, %v2918_v62 }
 0x849   :  { %v2095_v54 = vmul.f32 %v2094_v55, %v2915_v61  ;;  %v2098_v45 = vmul.f32 %v2091_v49, %v2921_v63 }
 0x84a   :  { %v2104_v27 = vpop.permute.xlu0 %2103 }
 0x84b   :  { %v2106_v26 = vpop.permute.xlu1 %2105 }
 0x84c   :  { %v2113_v30 = vsel %vm186_vm3, %v2104_v27, %v2106_v26 }
 0x84d   :  { %v2116_v46 = vmul.f32 %v2113_v30, %v2910_v59 }
 0x84e   :  { %v2108_v60 = vpop.permute.xlu0 %2107 }
 0x84f   :  { %v2112_v52 = vsel %vm186_vm3, %v2106_v26, %v2108_v60  ;;  %v2110_v42 = vpop.permute.xlu1 %2109  ;;  %v2628_v7 = vpack.c.bf16 %v2116_v46, %v2096_v31 }
 0x850   :  { %v2117_v56 = vmul.f32 %v2112_v52, %v2931_v10  ;;  %v2111_v58 = vsel %vm186_vm3, %v2108_v60, %v2110_v42  ;;  %v2114_v59 = vsel %vm186_vm3, %v2110_v42, %v2104_v27 }
 0x851   :  { %v2115_v14 = vmul.f32 %v2114_v59, %v2928_v9  ;;  %v2118_v5 = vmul.f32 %v2111_v58, %v2938_v16  ;;  %2629 = vmatprep.subr.bf16.mxu0 %v2628_v7 }
 0x852   :  { %v2128_v13 = vpop.permute.xlu0 %2127  ;;  %v2646_v21 = vpack.c.bf16 %v2117_v56, %v2097_v23 }
 0x853   :  { %v2630_v57 = vpack.c.bf16 %v2115_v14, %v2095_v54  ;;  %v2130_v10 = vpop.permute.xlu1 %2129  ;;  %v2644_v20 = vpack.c.bf16 %v2118_v5, %v2098_v45 }
 0x854   :  { %v2137_v19 = vsel %vm232_vm4, %v2128_v13, %v2130_v10 }
 0x855   :  { %2631 = vmatpush1.bf16.msra.mxu0 %v2630_v57  ;;  %2645 = vmatprep.subr.bf16.mxu1 %v2644_v20  ;;  %v2139_v63 = vmul.f32 %v2137_v19, %v2959_v47 }
 0x856   :  { %2647 = vmatpush1.bf16.msra.mxu1 %v2646_v21  ;;  %v2132_v61 = vpop.permute.xlu0 %2131 }
 0x857   :  { %v2136_v9 = vsel %vm232_vm4, %v2130_v10, %v2132_v61  ;;  %v2134_v16 = vpop.permute.xlu1 %2133  ;;  %v2634_v47 = vpack.c.bf16 %v2139_v63, %v3805_v53 }
 0x858   :  { %v2140_v62 = vmul.f32 %v2136_v9, %v2967_v50  ;;  %v2135_v6 = vsel %vm232_vm4, %v2132_v61, %v2134_v16  ;;  %v2138_v29 = vsel %vm232_vm4, %v2134_v16, %v2128_v13  ;;  %v2041_v13 = vld [vmem:[%s4010_s6] sm:$0xff] }
 0x859   :  { %v2141_v22 = vmul.f32 %v2135_v6, %v2970_v51  ;;  %v2142_v43 = vmul.f32 %v2138_v29, %v2962_v48 }
 0x85a   :  { %v2148_v37 = vpop.permute.xlu0 %2147  ;;  %v2632_v15 = vpack.c.bf16 %v2140_v62, %v3807_v12 }
 0x85b   :  { %v2650_v35 = vpack.c.bf16 %v2141_v22, %v3813_v17  ;;  %v2150_v4 = vpop.permute.xlu1 %2149  ;;  %v2648_v50 = vpack.c.bf16 %v2142_v43, %v3815_v18 }
 0x85c   :  { %2633 = vmatprep.subr.bf16.mxu0 %v2632_v15  ;;  %v2157_v48 = vsel %vm274_vm6, %v2148_v37, %v2150_v4 }
 0x85d   :  { %2635 = vmatpush1.bf16.msra.mxu0 %v2634_v47  ;;  %2649 = vmatprep.subr.bf16.mxu1 %v2648_v50  ;;  %v2159_v27 = vmul.f32 %v2157_v48, %v3022_v41  ;;  %v2686_v48 = vld [vmem:[%s4003_s0 + $0x10] sm:$0xff] }
 0x85e   :  { %2651 = vmatpush1.bf16.msra.mxu1 %v2650_v35  ;;  %v2152_v44 = vpop.permute.xlu0 %2151 }
 0x85f   :  { %v2154_v32 = vpop.permute.xlu1 %2153  ;;  %v2156_v53 = vsel %vm274_vm6, %v2150_v4, %v2152_v44  ;;  %v2684_v4 = vld [vmem:[%s4003_s0] sm:$0xff] }
 0x860   :  { %v2155_v17 = vsel %vm274_vm6, %v2152_v44, %v2154_v32  ;;  %v2158_v18 = vsel %vm274_vm6, %v2154_v32, %v2148_v37  ;;  %v2160_v46 = vmul.f32 %v2156_v53, %v2998_v1  ;;  %v2685_v32 = vld [vmem:[%s4003_s0 + $0x8] sm:$0xff] }
 0x861   :  { %v2161_v8 = vmul.f32 %v2155_v17, %v3003_v33  ;;  %v2162_v41 = vmul.f32 %v2158_v18, %v2995_v0  ;;  %v2687_v17 = vld [vmem:[%s4003_s0 + $0x18] sm:$0xff] }
 0x862   :  { %v2168_v34 = vpop.permute.xlu0 %2167 }
 0x863   :  { %v2170_v51 = vpop.permute.xlu1 %2169 }
 0x864   :  { %v2177_v12 = vsel %vm316_vm5, %v2168_v34, %v2170_v51 }
 0x865   :  { %v2179_v26 = vmul.f32 %v2177_v12, %v3008_v36 }
 0x866   :  { %v2172_v25 = vpop.permute.xlu0 %2171 }
 0x867   :  { %v2176_v30 = vsel %vm316_vm5, %v2170_v51, %v2172_v25  ;;  %v2174_v31 = vpop.permute.xlu1 %2173  ;;  %v2638_v56 = vpack.c.bf16 %v2179_v26, %v2159_v27 }
 0x868   :  { %v2180_v49 = vmul.f32 %v2176_v30, %v3016_v39  ;;  %v2175_v55 = vsel %vm316_vm5, %v2172_v25, %v2174_v31  ;;  %v2178_v60 = vsel %vm316_vm5, %v2174_v31, %v2168_v34 }
 0x869   :  { %v2181_v36 = vmul.f32 %v2175_v55, %v3019_v40  ;;  %v2182_v52 = vmul.f32 %v2178_v60, %v3013_v38 }
 0x86a   :  { %v2188_v42 = vpop.permute.xlu0 %2187  ;;  %v2636_v7 = vpack.c.bf16 %v2180_v49, %v2160_v46 }
 0x86b   :  { %v2654_v1 = vpack.c.bf16 %v2181_v36, %v2161_v8  ;;  %v2190_v58 = vpop.permute.xlu1 %2189  ;;  %v2652_v39 = vpack.c.bf16 %v2182_v52, %v2162_v41 }
 0x86c   :  { %2637 = vmatprep.subr.bf16.mxu0 %v2636_v7  ;;  %v2197_v59 = vsel %vm358_vm7, %v2188_v42, %v2190_v58 }
 0x86d   :  { %2639 = vmatpush1.bf16.msra.mxu0 %v2638_v56  ;;  %2653 = vmatprep.subr.bf16.mxu1 %v2652_v39  ;;  %v2199_v14 = vmul.f32 %v2197_v59, %v3056_v3 }
 0x86e   :  { %2655 = vmatpush1.bf16.msra.mxu1 %v2654_v1  ;;  %v2192_v33 = vpop.permute.xlu0 %2191 }
 0x86f   :  { %v2196_v0 = vsel %vm358_vm7, %v2190_v58, %v2192_v33  ;;  %v2194_v40 = vpop.permute.xlu1 %2193 }
 0x870   :  { %v2200_v38 = vmul.f32 %v2196_v0, %v3047_v24  ;;  %v2195_v54 = vsel %vm358_vm7, %v2192_v33, %v2194_v40  ;;  %v2198_v45 = vsel %vm358_vm7, %v2194_v40, %v2188_v42 }
 0x871   :  { %v2201_v5 = vmul.f32 %v2195_v54, %v3053_v2  ;;  %v2202_v23 = vmul.f32 %v2198_v45, %v3050_v28 }
 0x872   :  { %2267 = vmatprep.subr.mxu0 %v2200_v38 }
 0x873   :  { %2268 = vmatpush1.msra.mxu0 %v2199_v14  ;;  %2338 = vmatprep.subr.mxu1 %v2202_v23 }
 0x874   :  { %2458 = vmatmul.mubr.msk.f32.vlgmr.msra.gmra.mrb[10].mxu0 %vm433_vm8, %v2041_v13  ;;  %2339 = vmatpush1.msra.mxu1 %v2201_v5 }
 0x875   :  { %2459 = vmatmul.mubr.msk.f32.vlgmr.msra.gmra.mrb[10].mxu1 %vm433_vm8, %v2041_v13 }
 0x87f   :  { %v2246_v11 = vpop.permute.xlu0 %2245 }
 0x947   :  { %v2317_v24 = vpop.f32.mrb[10].mxu0 }
 0x948   :  { %v2318_v57 = vadd.f32 %v2317_v24, %v2246_v11  ;;  %v2319_v3 = vpop.f32.mrb[11].mxu0  ;;  %v2388_v10 = vpop.f32.mrb[10].mxu1 }
 0x949   :  { %v2320_v2 = vadd.f32 %v2319_v3, %v2246_v11  ;;  %v2389_v20 = vadd.f32 %v2388_v10, %v2246_v11  ;;  %v2390_v28 = vpop.f32.mrb[11].mxu1 }
 0x94a   :  { %v2460_v21 = vmul.f32 -1.442695, %v2318_v57  ;;  %v2391_v19 = vadd.f32 %v2390_v28, %v2246_v11 }
 0x94b   :  { %v2461_v61 = vmul.f32 -1.442695, %v2320_v2  ;;  %v2462_v63 = vmul.f32 -1.442695, %v2389_v20 }
 0x94c   :  { %2668 = vpow2.f32 %v2460_v21  ;;  %v2463_v9 = vmul.f32 -1.442695, %v2391_v19 }
 0x94d   :  { %2670 = vpow2.f32 %v2461_v61 }
 0x94e   :  { %2672 = vpow2.f32 %v2462_v63 }
 0x94f   :  { %2674 = vpow2.f32 %v2463_v9 }
 0x956   :  { %v2669_v16 = vpop.eup %2668 }
 0x957   :  { %v2671_v62 = vpop.eup %2670  ;;  %v2405_v6 = vadd.f32 1.0, %v2669_v16 }
 0x958   :  { %v2673_v29 = vpop.eup %2672  ;;  %v2406_v22 = vadd.f32 1.0, %v2671_v62 }
 0x959   :  { %v2675_v43 = vpop.eup %2674  ;;  %2676 = vrcp.f32 %v2405_v6  ;;  %v2407_v37 = vadd.f32 1.0, %v2673_v29 }
 0x95a   :  { %2678 = vrcp.f32 %v2406_v22  ;;  %v2408_v15 = vadd.f32 1.0, %v2675_v43 }
 0x95b   :  { %2680 = vrcp.f32 %v2407_v37 }
 0x95c   :  { %2682 = vrcp.f32 %v2408_v15 }
 0x963   :  { %v2677_v47 = vpop.eup %2676 }
 0x964   :  { %v2679_v35 = vpop.eup %2678  ;;  %v2417_v50 = vmul.f32 %v2684_v4, %v2677_v47 }
 0x965   :  { %v2681_v44 = vpop.eup %2680  ;;  %v2418_v34 = vmul.f32 %v2685_v32, %v2679_v35 }
 0x966   :  { %v2683_v51 = vpop.eup %2682  ;;  %v2419_v12 = vmul.f32 %v2686_v48, %v2681_v44 }
 0x967   :  { %v2425_v53 = vcombine.low %v2417_v50, %v2418_v34  ;;  %v2420_v18 = vmul.f32 %v2687_v17, %v2683_v51 }
 0x969   :  { %2429 = vst [vmem:[%s4011_s8] sm:$0xff] %v2425_v53  ;;  %v2426_v25 = vcombine.low %v2419_v12, %v2420_v18 }
 0x96b   :  { %2430 = vst [vmem:[%s4011_s8 + $0x8] sm:$0xff] %v2426_v25 }

</bundles_post_ra>
